<compile_context>
chip_gen: v5e
topology: v5e:2x2
jax: 0.10.0
libtpu: 0.0.40
codegen_flags: <defaults>
</compile_context>

<pallas_src>
import jax
import jax.numpy as jnp
from jax.experimental import pallas as pl
from jax.experimental.pallas import tpu as pltpu


def _round_up(n, m):
    return ((n + m - 1) // m) * m


def _vmem_capacity_bytes():
    try:
        return int(pltpu.get_tpu_info().vmem_capacity_bytes)
    except Exception:
        return 64 << 20  # conservative fallback (v7x-sized VMEM)


# ---------------------------------------------------------------------------
# Kernel
# ---------------------------------------------------------------------------
def make_qnet_kernel(hdim_true, padded, eps=1e-5):
    """Fused 4-layer MLP kernel. hdim_true is the un-padded hidden width (compile-time)."""
    inv_h = 1.0 / float(hdim_true)

    def kernel(x_ref, w1_ref, w2_ref, w3_ref, w4_ref, ln_ref, b4_ref, o_ref):
        cdt = w1_ref.dtype                       # MXU input dtype (bf16 by default)
        mask = ln_ref[9:10, :] if padded else None   # 1.0 on real lanes, 0.0 on padded lanes

        def lin_ln_relu(h, w_ref, row):
            # rows of ln_ref: [bias, gamma, beta] for this block
            b = ln_ref[row:row + 1, :]
            g = ln_ref[row + 1:row + 2, :]
            be = ln_ref[row + 2:row + 3, :]
            # Linear: bf16 x bf16 -> f32 accumulation on the MXU, bias add in f32.
            h = jnp.dot(h.astype(cdt), w_ref[...],
                        preferred_element_type=jnp.float32) + b
            # LayerNorm (f32), centered form; padded lanes are zeroed via the mask so they
            # contribute nothing to the variance.  rsqrt -> EUP (free slot), gamma folded in.
            m = jnp.sum(h, axis=-1, keepdims=True) * inv_h
            d = h - m
            if padded:
                d = d * mask
            v = jnp.sum(d * d, axis=-1, keepdims=True) * inv_h
            scale = jax.lax.rsqrt(v + eps) * g
            return jnp.maximum(d * scale + be, 0.0)          # ReLU

        h = lin_ln_relu(x_ref[...], w1_ref, 0)
        h = lin_ln_relu(h, w2_ref, 3)
        h = lin_ln_relu(h, w3_ref, 6)

        out = jnp.dot(h.astype(cdt), w4_ref[...],
                      preferred_element_type=jnp.float32) + b4_ref[...]
        o_ref[...] = out.astype(o_ref.dtype)     # lane-dense (odim padded to 128) store

    return kernel


# ---------------------------------------------------------------------------
# One-time parameter preparation (keep out of the per-call forward!)
# ---------------------------------------------------------------------------
def prepare_qnet_params(params):
    """Pack/pad the raw params once.  Returns a dict consumed by qnet_forward."""
    w1 = params["w1"]
    vdim, hdim = w1.shape
    odim = params["w4"].shape[1]
    hdim_pad = _round_up(hdim, 128)
    odim_pad = _round_up(odim, 128)
    hp, op = hdim_pad - hdim, odim_pad - odim

    w1p = jnp.pad(w1, ((0, 0), (0, hp)))
    w2p = jnp.pad(params["w2"], ((0, hp), (0, hp)))
    w3p = jnp.pad(params["w3"], ((0, hp), (0, hp)))
    w4p = jnp.pad(params["w4"], ((0, hp), (0, op)))
    b4p = jnp.pad(params["b4"].astype(jnp.float32), ((0, 0), (0, op)))

    def padv(v):
        return jnp.pad(v.astype(jnp.float32), ((0, 0), (0, hp)))

    mask = jnp.concatenate(
        [jnp.ones((1, hdim), jnp.float32), jnp.zeros((1, hp), jnp.float32)], axis=1)
    # 10 rows: b1,g1,be1, b2,g2,be2, b3,g3,be3, lane-mask  -> ONE DMA instead of ten.
    ln_pack = jnp.concatenate(
        [padv(params[k]) for k in ("b1", "g1", "be1", "b2", "g2", "be2", "b3", "g3", "be3")]
        + [mask], axis=0)

    return {
        "w1": w1p, "w2": w2p, "w3": w3p, "w4": w4p, "ln": ln_pack, "b4": b4p,
        "vdim": vdim, "hdim": hdim, "hdim_pad": hdim_pad,
        "odim": odim, "odim_pad": odim_pad,
    }


# ---------------------------------------------------------------------------
# Forward wrapper
# ---------------------------------------------------------------------------
def qnet_forward(x, prepped, *, batch_tile=None):
    """x: (B, vdim) float32.  prepped: output of prepare_qnet_params()."""
    B, vdim = x.shape
    assert vdim == prepped["vdim"], "x feature dim does not match params"
    hdim, hdim_pad = prepped["hdim"], prepped["hdim_pad"]
    odim, odim_pad = prepped["odim"], prepped["odim_pad"]
    w1, w2, w3, w4 = prepped["w1"], prepped["w2"], prepped["w3"], prepped["w4"]
    ln_pack, b4 = prepped["ln"], prepped["b4"]

    # ---- batch tile: big by default, multiple of 8, but >=2 grid steps when B allows ----
    tb = 512 if batch_tile is None else int(batch_tile)
    tb = _round_up(max(8, tb), 8)
    tb = min(tb, _round_up(B, 8))
    while pl.cdiv(B, tb) < 2 and tb > 8:          # give v7x's 2nd TensorCore work
        tb = max(8, _round_up(tb // 2, 8))
    n_steps = pl.cdiv(B, tb)
    grid = (n_steps,)
    Bp = n_steps * tb

    # ---- cost estimate / VMEM budget ----
    w_bytes = sum(int(w.size) * w.dtype.itemsize for w in (w1, w2, w3, w4))
    vec_bytes = (int(ln_pack.size) + int(b4.size)) * 4
    flops = 2 * Bp * (vdim * hdim_pad + 2 * hdim_pad * hdim_pad + hdim_pad * odim_pad)
    cost = pl.CostEstimate(
        flops=int(flops),
        transcendentals=int(3 * Bp),                          # one rsqrt per row per LN
        bytes_accessed=int(B * vdim * 4 + B * odim_pad * 4 + w_bytes + vec_bytes))

    cap = _vmem_capacity_bytes()
    io_bytes = 2 * tb * (max(vdim, 128) + odim_pad) * 4       # double-buffered x / out tiles
    act_bytes = 6 * tb * hdim_pad * 4                         # f32 intermediates headroom

    kernel = make_qnet_kernel(hdim, padded=(hdim_pad != hdim))

    def _run(single_buffer_consts):
        const_bufs = 1 if single_buffer_consts else 2
        needed = const_bufs * (w_bytes + vec_bytes) + io_bytes + act_bytes
        vmem_limit = int(min(max(2 * needed, 16 << 20), cap - (8 << 20)))

        def const_spec(arr):
            nd = arr.ndim
            kwargs = {}
            if single_buffer_consts:
                kwargs["pipeline_mode"] = pl.Buffered(1)      # fetched once; 1 buffer suffices
            return pl.BlockSpec(arr.shape, lambda *_: (0,) * nd, **kwargs)

        in_specs = [pl.BlockSpec((tb, vdim), lambda i: (i, 0)),
                    const_spec(w1), const_spec(w2), const_spec(w3), const_spec(w4),
                    const_spec(ln_pack), const_spec(b4)]
        out_spec = pl.BlockSpec((tb, odim_pad), lambda i: (i, 0))

        return pl.pallas_call(
            kernel,
            out_shape=jax.ShapeDtypeStruct((B, odim_pad), x.dtype),
            grid_spec=pltpu.PrefetchScalarGridSpec(
                num_scalar_prefetch=0,
                grid=grid,
                in_specs=in_specs,
                out_specs=out_spec,
            ),
            compiler_params=pltpu.CompilerParams(
                dimension_semantics=("parallel",),
                vmem_limit_bytes=vmem_limit,
            ),
            cost_estimate=cost,
        )(x, w1, w2, w3, w4, ln_pack, b4)

    try:
        out = _run(True)
    except Exception:
        # Fallback if this jax version rejects single-buffered constant BlockSpecs.
        out = _run(False)

    return out[:, :odim]


# ---------------------------------------------------------------------------
# Params / reference
# ---------------------------------------------------------------------------
def init_qnet_params(key, vdim, hdim, odim, weight_dtype=jnp.bfloat16):
    """PyTorch-style init: Linear W,b ~ U(-1/sqrt(fan_in), 1/sqrt(fan_in)); LN gamma=1, beta=0.
    Weights are stored (in, out) and cast to `weight_dtype` (bf16 feeds the MXU efficiently)."""
    ks = jax.random.split(key, 8)

    def linear(kw, kb, fan_in, fan_out):
        bound = 1.0 / jnp.sqrt(fan_in)
        w = jax.random.uniform(kw, (fan_in, fan_out), jnp.float32, -bound, bound)
        b = jax.random.uniform(kb, (1, fan_out), jnp.float32, -bound, bound)
        return w.astype(weight_dtype), b

    w1, b1 = linear(ks[0], ks[1], vdim, hdim)
    w2, b2 = linear(ks[2], ks[3], hdim, hdim)
    w3, b3 = linear(ks[4], ks[5], hdim, hdim)
    w4, b4 = linear(ks[6], ks[7], hdim, odim)

    ones = jnp.ones((1, hdim), jnp.float32)
    zeros = jnp.zeros((1, hdim), jnp.float32)
    return {
        "w1": w1, "b1": b1, "g1": ones, "be1": zeros,
        "w2": w2, "b2": b2, "g2": ones, "be2": zeros,
        "w3": w3, "b3": b3, "g3": ones, "be3": zeros,
        "w4": w4, "b4": b4,
    }


def qnet_reference(x, p):
    """Pure-JAX reference mirroring the kernel's dtype strategy (cast matmul inputs to the
    weight dtype, f32 accumulation, f32 LayerNorm/ReLU)."""
    cdt = p["w1"].dtype

    def ln(h, g, b):
        m = jnp.mean(h, axis=-1, keepdims=True)
        v = jnp.mean((h - m) ** 2, axis=-1, keepdims=True)
        return (h - m) * jax.lax.rsqrt(v + 1e-5) * g + b

    def lin(h, w, b):
        return jnp.dot(h.astype(cdt), w, preferred_element_type=jnp.float32) + b

    h = jnp.maximum(ln(lin(x, p["w1"], p["b1"]), p["g1"], p["be1"]), 0.0)
    h = jnp.maximum(ln(lin(h, p["w2"], p["b2"]), p["g2"], p["be2"]), 0.0)
    h = jnp.maximum(ln(lin(h, p["w3"], p["b3"]), p["g3"], p["be3"]), 0.0)
    return lin(h, p["w4"], p["b4"])


# ---------------------------------------------------------------------------
# Test
# ---------------------------------------------------------------------------
if __name__ == "__main__":
    key = jax.random.PRNGKey(0)
    k_x, k_p = jax.random.split(key)

    # Small shapes; B=45 exercises the ragged last batch block, hdim=32/odim=4 exercise
    # the lane-padding (hdim->128, odim->128) paths.
    B, vdim, hdim, odim = 45, 16, 32, 4
    x = jax.random.normal(k_x, (B, vdim), jnp.float32)
    params = init_qnet_params(k_p, vdim, hdim, odim, weight_dtype=jnp.bfloat16)
    prepped = prepare_qnet_params(params)     # one-time pack/pad, outside the forward

    # Multi-step grid (3 batch tiles of 16 rows) -> pipelined x DMA, megacore sharding.
    out = jax.block_until_ready(qnet_forward(x, prepped, batch_tile=16))
    assert out.shape == (B, odim)

    # Exact-semantics check against a reference that mirrors the bf16-in / f32-acc matmuls.
    ref = qnet_reference(x, params)
    err = float(jnp.max(jnp.abs(out - ref)))
    assert err < 1e-3, f"max abs err vs mirrored reference = {err}"

    # Coarse sanity check against a pure-f32 forward (difference = bf16 weight rounding only).
    params_f32 = {k: v.astype(jnp.float32) for k, v in params.items()}
    ref32 = qnet_reference(x, params_f32)
    err32 = float(jnp.max(jnp.abs(out - ref32)))
    assert err32 < 1e-1, f"max abs err vs f32 reference = {err32}"

    # Default tiling path (tb auto-derived, >=2 grid steps) must agree with the tiled run.
    out_default = jax.block_until_ready(qnet_forward(x, prepped))
    assert float(jnp.max(jnp.abs(out_default - out))) < 1e-5

    print("KERNEL_OK")
</pallas_src>

<mosaic_0001>
module attributes {stable_mosaic.version = 11 : i64} {
  func.func @kernel(%arg0: i32, %arg1: memref<16x16xf32, #tpu.memory_space<vmem>>, %arg2: memref<16x128xbf16, #tpu.memory_space<vmem>>, %arg3: memref<128x128xbf16, #tpu.memory_space<vmem>>, %arg4: memref<128x128xbf16, #tpu.memory_space<vmem>>, %arg5: memref<128x128xbf16, #tpu.memory_space<vmem>>, %arg6: memref<10x128xf32, #tpu.memory_space<vmem>>, %arg7: memref<1x128xf32, #tpu.memory_space<vmem>>, %arg8: memref<16x128xf32, #tpu.memory_space<vmem>>) attributes {dimension_semantics = [#tpu.dimension_semantics<parallel>], iteration_bounds = array<i64: 3>, scalar_prefetch = 0 : i64, scratch_operands = 0 : i64, tpu.core_type = #tpu.core_type<tc>, window_params = [{transform_indices = @transform_0, window_bounds = array<i64: 16, 16>}, {pipeline_mode = #tpu.pipeline_mode<synchronous>, transform_indices = @transform_1, window_bounds = array<i64: 16, 128>}, {pipeline_mode = #tpu.pipeline_mode<synchronous>, transform_indices = @transform_2, window_bounds = array<i64: 128, 128>}, {pipeline_mode = #tpu.pipeline_mode<synchronous>, transform_indices = @transform_3, window_bounds = array<i64: 128, 128>}, {pipeline_mode = #tpu.pipeline_mode<synchronous>, transform_indices = @transform_4, window_bounds = array<i64: 128, 128>}, {pipeline_mode = #tpu.pipeline_mode<synchronous>, transform_indices = @transform_5, window_bounds = array<i64: 10, 128>}, {pipeline_mode = #tpu.pipeline_mode<synchronous>, transform_indices = @transform_6, window_bounds = array<i64: 1, 128>}, {transform_indices = @transform_7, window_bounds = array<i64: 16, 128>}]} {
    %c9 = arith.constant 9 : index
    %c0 = arith.constant 0 : index
    %0 = vector.load %arg6[%c9, %c0] : memref<10x128xf32, #tpu.memory_space<vmem>>, vector<1x128xf32>
    %c0_0 = arith.constant 0 : index
    %c0_1 = arith.constant 0 : index
    %1 = vector.load %arg1[%c0_0, %c0_1] : memref<16x16xf32, #tpu.memory_space<vmem>>, vector<16x16xf32>
    %c0_2 = arith.constant 0 : index
    %c0_3 = arith.constant 0 : index
    %2 = vector.load %arg6[%c0_2, %c0_3] : memref<10x128xf32, #tpu.memory_space<vmem>>, vector<1x128xf32>
    %c1 = arith.constant 1 : index
    %c0_4 = arith.constant 0 : index
    %3 = vector.load %arg6[%c1, %c0_4] : memref<10x128xf32, #tpu.memory_space<vmem>>, vector<1x128xf32>
    %c2 = arith.constant 2 : index
    %c0_5 = arith.constant 0 : index
    %4 = vector.load %arg6[%c2, %c0_5] : memref<10x128xf32, #tpu.memory_space<vmem>>, vector<1x128xf32>
    %5 = arith.truncf %1 : vector<16x16xf32> to vector<16x16xbf16>
    %c0_6 = arith.constant 0 : index
    %c0_7 = arith.constant 0 : index
    %6 = vector.load %arg2[%c0_6, %c0_7] : memref<16x128xbf16, #tpu.memory_space<vmem>>, vector<16x128xbf16>
    %cst = arith.constant dense<0.000000e+00> : vector<16x128xf32>
    %7 = tpu.matmul %5, %6, %cst {dimension_numbers = #tpu.dot_dimension_numbers<[1], [0], [0], [1], [0, 0, 1, 1], [], []>} : vector<16x16xbf16>, vector<16x128xbf16>, vector<16x128xf32> -> vector<16x128xf32>
    %8 = vector.broadcast %2 : vector<1x128xf32> to vector<16x128xf32>
    %9 = arith.addf %7, %8 : vector<16x128xf32>
    %cst_8 = arith.constant dense<0.000000e+00> : vector<16xf32>
    %10 = vector.multi_reduction <add>, %9, %cst_8 [1] : vector<16x128xf32> to vector<16xf32>
    %11 = vector.shape_cast %10 : vector<16xf32> to vector<16x1xf32>
    %cst_9 = arith.constant 3.125000e-02 : f32
    %12 = vector.broadcast %cst_9 : f32 to vector<16x1xf32>
    %13 = arith.mulf %11, %12 : vector<16x1xf32>
    %14 = vector.broadcast %13 : vector<16x1xf32> to vector<16x128xf32>
    %15 = arith.subf %9, %14 : vector<16x128xf32>
    %16 = vector.broadcast %0 : vector<1x128xf32> to vector<16x128xf32>
    %17 = arith.mulf %15, %16 : vector<16x128xf32>
    %18 = arith.mulf %17, %17 : vector<16x128xf32>
    %cst_10 = arith.constant dense<0.000000e+00> : vector<16xf32>
    %19 = vector.multi_reduction <add>, %18, %cst_10 [1] : vector<16x128xf32> to vector<16xf32>
    %20 = vector.shape_cast %19 : vector<16xf32> to vector<16x1xf32>
    %cst_11 = arith.constant 3.125000e-02 : f32
    %21 = vector.broadcast %cst_11 : f32 to vector<16x1xf32>
    %22 = arith.mulf %20, %21 : vector<16x1xf32>
    %cst_12 = arith.constant 9.99999974E-6 : f32
    %23 = vector.broadcast %cst_12 : f32 to vector<16x1xf32>
    %24 = arith.addf %22, %23 : vector<16x1xf32>
    %25 = math.rsqrt %24 : vector<16x1xf32>
    %26 = vector.broadcast %25 : vector<16x1xf32> to vector<16x128xf32>
    %27 = vector.broadcast %3 : vector<1x128xf32> to vector<16x128xf32>
    %28 = arith.mulf %26, %27 : vector<16x128xf32>
    %29 = arith.mulf %17, %28 : vector<16x128xf32>
    %30 = vector.broadcast %4 : vector<1x128xf32> to vector<16x128xf32>
    %31 = arith.addf %29, %30 : vector<16x128xf32>
    %cst_13 = arith.constant 0.000000e+00 : f32
    %32 = vector.broadcast %cst_13 : f32 to vector<16x128xf32>
    %33 = arith.maximumf %31, %32 : vector<16x128xf32>
    %c3 = arith.constant 3 : index
    %c0_14 = arith.constant 0 : index
    %34 = vector.load %arg6[%c3, %c0_14] : memref<10x128xf32, #tpu.memory_space<vmem>>, vector<1x128xf32>
    %c4 = arith.constant 4 : index
    %c0_15 = arith.constant 0 : index
    %35 = vector.load %arg6[%c4, %c0_15] : memref<10x128xf32, #tpu.memory_space<vmem>>, vector<1x128xf32>
    %c5 = arith.constant 5 : index
    %c0_16 = arith.constant 0 : index
    %36 = vector.load %arg6[%c5, %c0_16] : memref<10x128xf32, #tpu.memory_space<vmem>>, vector<1x128xf32>
    %37 = arith.truncf %33 : vector<16x128xf32> to vector<16x128xbf16>
    %c0_17 = arith.constant 0 : index
    %c0_18 = arith.constant 0 : index
    %38 = vector.load %arg3[%c0_17, %c0_18] : memref<128x128xbf16, #tpu.memory_space<vmem>>, vector<128x128xbf16>
    %cst_19 = arith.constant dense<0.000000e+00> : vector<16x128xf32>
    %39 = tpu.matmul %37, %38, %cst_19 {dimension_numbers = #tpu.dot_dimension_numbers<[1], [0], [0], [1], [0, 0, 1, 1], [], []>} : vector<16x128xbf16>, vector<128x128xbf16>, vector<16x128xf32> -> vector<16x128xf32>
    %40 = vector.broadcast %34 : vector<1x128xf32> to vector<16x128xf32>
    %41 = arith.addf %39, %40 : vector<16x128xf32>
    %cst_20 = arith.constant dense<0.000000e+00> : vector<16xf32>
    %42 = vector.multi_reduction <add>, %41, %cst_20 [1] : vector<16x128xf32> to vector<16xf32>
    %43 = vector.shape_cast %42 : vector<16xf32> to vector<16x1xf32>
    %cst_21 = arith.constant 3.125000e-02 : f32
    %44 = vector.broadcast %cst_21 : f32 to vector<16x1xf32>
    %45 = arith.mulf %43, %44 : vector<16x1xf32>
    %46 = vector.broadcast %45 : vector<16x1xf32> to vector<16x128xf32>
    %47 = arith.subf %41, %46 : vector<16x128xf32>
    %48 = vector.broadcast %0 : vector<1x128xf32> to vector<16x128xf32>
    %49 = arith.mulf %47, %48 : vector<16x128xf32>
    %50 = arith.mulf %49, %49 : vector<16x128xf32>
    %cst_22 = arith.constant dense<0.000000e+00> : vector<16xf32>
    %51 = vector.multi_reduction <add>, %50, %cst_22 [1] : vector<16x128xf32> to vector<16xf32>
    %52 = vector.shape_cast %51 : vector<16xf32> to vector<16x1xf32>
    %cst_23 = arith.constant 3.125000e-02 : f32
    %53 = vector.broadcast %cst_23 : f32 to vector<16x1xf32>
    %54 = arith.mulf %52, %53 : vector<16x1xf32>
    %cst_24 = arith.constant 9.99999974E-6 : f32
    %55 = vector.broadcast %cst_24 : f32 to vector<16x1xf32>
    %56 = arith.addf %54, %55 : vector<16x1xf32>
    %57 = math.rsqrt %56 : vector<16x1xf32>
    %58 = vector.broadcast %57 : vector<16x1xf32> to vector<16x128xf32>
    %59 = vector.broadcast %35 : vector<1x128xf32> to vector<16x128xf32>
    %60 = arith.mulf %58, %59 : vector<16x128xf32>
    %61 = arith.mulf %49, %60 : vector<16x128xf32>
    %62 = vector.broadcast %36 : vector<1x128xf32> to vector<16x128xf32>
    %63 = arith.addf %61, %62 : vector<16x128xf32>
    %cst_25 = arith.constant 0.000000e+00 : f32
    %64 = vector.broadcast %cst_25 : f32 to vector<16x128xf32>
    %65 = arith.maximumf %63, %64 : vector<16x128xf32>
    %c6 = arith.constant 6 : index
    %c0_26 = arith.constant 0 : index
    %66 = vector.load %arg6[%c6, %c0_26] : memref<10x128xf32, #tpu.memory_space<vmem>>, vector<1x128xf32>
    %c7 = arith.constant 7 : index
    %c0_27 = arith.constant 0 : index
    %67 = vector.load %arg6[%c7, %c0_27] : memref<10x128xf32, #tpu.memory_space<vmem>>, vector<1x128xf32>
    %c8 = arith.constant 8 : index
    %c0_28 = arith.constant 0 : index
    %68 = vector.load %arg6[%c8, %c0_28] : memref<10x128xf32, #tpu.memory_space<vmem>>, vector<1x128xf32>
    %69 = arith.truncf %65 : vector<16x128xf32> to vector<16x128xbf16>
    %c0_29 = arith.constant 0 : index
    %c0_30 = arith.constant 0 : index
    %70 = vector.load %arg4[%c0_29, %c0_30] : memref<128x128xbf16, #tpu.memory_space<vmem>>, vector<128x128xbf16>
    %cst_31 = arith.constant dense<0.000000e+00> : vector<16x128xf32>
    %71 = tpu.matmul %69, %70, %cst_31 {dimension_numbers = #tpu.dot_dimension_numbers<[1], [0], [0], [1], [0, 0, 1, 1], [], []>} : vector<16x128xbf16>, vector<128x128xbf16>, vector<16x128xf32> -> vector<16x128xf32>
    %72 = vector.broadcast %66 : vector<1x128xf32> to vector<16x128xf32>
    %73 = arith.addf %71, %72 : vector<16x128xf32>
    %cst_32 = arith.constant dense<0.000000e+00> : vector<16xf32>
    %74 = vector.multi_reduction <add>, %73, %cst_32 [1] : vector<16x128xf32> to vector<16xf32>
    %75 = vector.shape_cast %74 : vector<16xf32> to vector<16x1xf32>
    %cst_33 = arith.constant 3.125000e-02 : f32
    %76 = vector.broadcast %cst_33 : f32 to vector<16x1xf32>
    %77 = arith.mulf %75, %76 : vector<16x1xf32>
    %78 = vector.broadcast %77 : vector<16x1xf32> to vector<16x128xf32>
    %79 = arith.subf %73, %78 : vector<16x128xf32>
    %80 = vector.broadcast %0 : vector<1x128xf32> to vector<16x128xf32>
    %81 = arith.mulf %79, %80 : vector<16x128xf32>
    %82 = arith.mulf %81, %81 : vector<16x128xf32>
    %cst_34 = arith.constant dense<0.000000e+00> : vector<16xf32>
    %83 = vector.multi_reduction <add>, %82, %cst_34 [1] : vector<16x128xf32> to vector<16xf32>
    %84 = vector.shape_cast %83 : vector<16xf32> to vector<16x1xf32>
    %cst_35 = arith.constant 3.125000e-02 : f32
    %85 = vector.broadcast %cst_35 : f32 to vector<16x1xf32>
    %86 = arith.mulf %84, %85 : vector<16x1xf32>
    %cst_36 = arith.constant 9.99999974E-6 : f32
    %87 = vector.broadcast %cst_36 : f32 to vector<16x1xf32>
    %88 = arith.addf %86, %87 : vector<16x1xf32>
    %89 = math.rsqrt %88 : vector<16x1xf32>
    %90 = vector.broadcast %89 : vector<16x1xf32> to vector<16x128xf32>
    %91 = vector.broadcast %67 : vector<1x128xf32> to vector<16x128xf32>
    %92 = arith.mulf %90, %91 : vector<16x128xf32>
    %93 = arith.mulf %81, %92 : vector<16x128xf32>
    %94 = vector.broadcast %68 : vector<1x128xf32> to vector<16x128xf32>
    %95 = arith.addf %93, %94 : vector<16x128xf32>
    %cst_37 = arith.constant 0.000000e+00 : f32
    %96 = vector.broadcast %cst_37 : f32 to vector<16x128xf32>
    %97 = arith.maximumf %95, %96 : vector<16x128xf32>
    %98 = arith.truncf %97 : vector<16x128xf32> to vector<16x128xbf16>
    %c0_38 = arith.constant 0 : index
    %c0_39 = arith.constant 0 : index
    %99 = vector.load %arg5[%c0_38, %c0_39] : memref<128x128xbf16, #tpu.memory_space<vmem>>, vector<128x128xbf16>
    %cst_40 = arith.constant dense<0.000000e+00> : vector<16x128xf32>
    %100 = tpu.matmul %98, %99, %cst_40 {dimension_numbers = #tpu.dot_dimension_numbers<[1], [0], [0], [1], [0, 0, 1, 1], [], []>} : vector<16x128xbf16>, vector<128x128xbf16>, vector<16x128xf32> -> vector<16x128xf32>
    %c0_41 = arith.constant 0 : index
    %c0_42 = arith.constant 0 : index
    %101 = vector.load %arg7[%c0_41, %c0_42] : memref<1x128xf32, #tpu.memory_space<vmem>>, vector<1x128xf32>
    %102 = vector.broadcast %101 : vector<1x128xf32> to vector<16x128xf32>
    %103 = arith.addf %100, %102 : vector<16x128xf32>
    %c0_43 = arith.constant 0 : index
    %c0_44 = arith.constant 0 : index
    %104 = vector.load %arg8[%c0_43, %c0_44] : memref<16x128xf32, #tpu.memory_space<vmem>>, vector<16x128xf32>
    tpu.vector_store %arg8[%c0_43, %c0_44], %103 {strides = array<i32>} : memref<16x128xf32, #tpu.memory_space<vmem>>, vector<16x128xf32>,
    return
  }
  func.func @transform_0(%arg0: i32) -> (i32, i32) {
    %c0_i32 = arith.constant 0 : i32
    %c0_i32_0 = arith.constant 0 : i32
    return %arg0, %c0_i32 : i32, i32
  }
  func.func @transform_1(%arg0: i32) -> (i32, i32) {
    %c0_i32 = arith.constant 0 : i32
    %c0_i32_0 = arith.constant 0 : i32
    %c0_i32_1 = arith.constant 0 : i32
    return %c0_i32, %c0_i32_0 : i32, i32
  }
  func.func @transform_2(%arg0: i32) -> (i32, i32) {
    %c0_i32 = arith.constant 0 : i32
    %c0_i32_0 = arith.constant 0 : i32
    %c0_i32_1 = arith.constant 0 : i32
    return %c0_i32, %c0_i32_0 : i32, i32
  }
  func.func @transform_3(%arg0: i32) -> (i32, i32) {
    %c0_i32 = arith.constant 0 : i32
    %c0_i32_0 = arith.constant 0 : i32
    %c0_i32_1 = arith.constant 0 : i32
    return %c0_i32, %c0_i32_0 : i32, i32
  }
  func.func @transform_4(%arg0: i32) -> (i32, i32) {
    %c0_i32 = arith.constant 0 : i32
    %c0_i32_0 = arith.constant 0 : i32
    %c0_i32_1 = arith.constant 0 : i32
    return %c0_i32, %c0_i32_0 : i32, i32
  }
  func.func @transform_5(%arg0: i32) -> (i32, i32) {
    %c0_i32 = arith.constant 0 : i32
    %c0_i32_0 = arith.constant 0 : i32
    %c0_i32_1 = arith.constant 0 : i32
    return %c0_i32, %c0_i32_0 : i32, i32
  }
  func.func @transform_6(%arg0: i32) -> (i32, i32) {
    %c0_i32 = arith.constant 0 : i32
    %c0_i32_0 = arith.constant 0 : i32
    %c0_i32_1 = arith.constant 0 : i32
    return %c0_i32, %c0_i32_0 : i32, i32
  }
  func.func @transform_7(%arg0: i32) -> (i32, i32) {
    %c0_i32 = arith.constant 0 : i32
    %c0_i32_0 = arith.constant 0 : i32
    return %arg0, %c0_i32 : i32, i32
  }
}

module attributes {stable_mosaic.version = 11 : i64} {
  func.func @kernel(%arg0: i32, %arg1: memref<16x16xf32, #tpu.memory_space<vmem>>, %arg2: memref<16x128xbf16, #tpu.memory_space<vmem>>, %arg3: memref<128x128xbf16, #tpu.memory_space<vmem>>, %arg4: memref<128x128xbf16, #tpu.memory_space<vmem>>, %arg5: memref<128x128xbf16, #tpu.memory_space<vmem>>, %arg6: memref<10x128xf32, #tpu.memory_space<vmem>>, %arg7: memref<1x128xf32, #tpu.memory_space<vmem>>, %arg8: memref<16x128xf32, #tpu.memory_space<vmem>>) attributes {dimension_semantics = [#tpu.dimension_semantics<parallel>], iteration_bounds = array<i64: 3>, scalar_prefetch = 0 : i64, scratch_operands = 0 : i64, tpu.core_type = #tpu.core_type<tc>, window_params = [{transform_indices = @transform_0, window_bounds = array<i64: 16, 16>}, {pipeline_mode = #tpu.pipeline_mode<synchronous>, transform_indices = @transform_1, window_bounds = array<i64: 16, 128>}, {pipeline_mode = #tpu.pipeline_mode<synchronous>, transform_indices = @transform_2, window_bounds = array<i64: 128, 128>}, {pipeline_mode = #tpu.pipeline_mode<synchronous>, transform_indices = @transform_3, window_bounds = array<i64: 128, 128>}, {pipeline_mode = #tpu.pipeline_mode<synchronous>, transform_indices = @transform_4, window_bounds = array<i64: 128, 128>}, {pipeline_mode = #tpu.pipeline_mode<synchronous>, transform_indices = @transform_5, window_bounds = array<i64: 10, 128>}, {pipeline_mode = #tpu.pipeline_mode<synchronous>, transform_indices = @transform_6, window_bounds = array<i64: 1, 128>}, {transform_indices = @transform_7, window_bounds = array<i64: 16, 128>}]} {
    %c9 = arith.constant 9 : index
    %c0 = arith.constant 0 : index
    %0 = vector.load %arg6[%c9, %c0] : memref<10x128xf32, #tpu.memory_space<vmem>>, vector<1x128xf32>
    %c0_0 = arith.constant 0 : index
    %c0_1 = arith.constant 0 : index
    %1 = vector.load %arg1[%c0_0, %c0_1] : memref<16x16xf32, #tpu.memory_space<vmem>>, vector<16x16xf32>
    %c0_2 = arith.constant 0 : index
    %c0_3 = arith.constant 0 : index
    %2 = vector.load %arg6[%c0_2, %c0_3] : memref<10x128xf32, #tpu.memory_space<vmem>>, vector<1x128xf32>
    %c1 = arith.constant 1 : index
    %c0_4 = arith.constant 0 : index
    %3 = vector.load %arg6[%c1, %c0_4] : memref<10x128xf32, #tpu.memory_space<vmem>>, vector<1x128xf32>
    %c2 = arith.constant 2 : index
    %c0_5 = arith.constant 0 : index
    %4 = vector.load %arg6[%c2, %c0_5] : memref<10x128xf32, #tpu.memory_space<vmem>>, vector<1x128xf32>
    %5 = arith.truncf %1 : vector<16x16xf32> to vector<16x16xbf16>
    %c0_6 = arith.constant 0 : index
    %c0_7 = arith.constant 0 : index
    %6 = vector.load %arg2[%c0_6, %c0_7] : memref<16x128xbf16, #tpu.memory_space<vmem>>, vector<16x128xbf16>
    %cst = arith.constant dense<0.000000e+00> : vector<16x128xf32>
    %7 = tpu.matmul %5, %6, %cst {dimension_numbers = #tpu.dot_dimension_numbers<[1], [0], [0], [1], [0, 0, 1, 1], [], []>} : vector<16x16xbf16>, vector<16x128xbf16>, vector<16x128xf32> -> vector<16x128xf32>
    %8 = vector.broadcast %2 : vector<1x128xf32> to vector<16x128xf32>
    %9 = arith.addf %7, %8 : vector<16x128xf32>
    %cst_8 = arith.constant dense<0.000000e+00> : vector<16xf32>
    %10 = vector.multi_reduction <add>, %9, %cst_8 [1] : vector<16x128xf32> to vector<16xf32>
    %11 = vector.shape_cast %10 : vector<16xf32> to vector<16x1xf32>
    %cst_9 = arith.constant 3.125000e-02 : f32
    %12 = vector.broadcast %cst_9 : f32 to vector<16x1xf32>
    %13 = arith.mulf %11, %12 : vector<16x1xf32>
    %14 = vector.broadcast %13 : vector<16x1xf32> to vector<16x128xf32>
    %15 = arith.subf %9, %14 : vector<16x128xf32>
    %16 = vector.broadcast %0 : vector<1x128xf32> to vector<16x128xf32>
    %17 = arith.mulf %15, %16 : vector<16x128xf32>
    %18 = arith.mulf %17, %17 : vector<16x128xf32>
    %cst_10 = arith.constant dense<0.000000e+00> : vector<16xf32>
    %19 = vector.multi_reduction <add>, %18, %cst_10 [1] : vector<16x128xf32> to vector<16xf32>
    %20 = vector.shape_cast %19 : vector<16xf32> to vector<16x1xf32>
    %cst_11 = arith.constant 3.125000e-02 : f32
    %21 = vector.broadcast %cst_11 : f32 to vector<16x1xf32>
    %22 = arith.mulf %20, %21 : vector<16x1xf32>
    %cst_12 = arith.constant 9.99999974E-6 : f32
    %23 = vector.broadcast %cst_12 : f32 to vector<16x1xf32>
    %24 = arith.addf %22, %23 : vector<16x1xf32>
    %25 = math.rsqrt %24 : vector<16x1xf32>
    %26 = vector.broadcast %25 : vector<16x1xf32> to vector<16x128xf32>
    %27 = vector.broadcast %3 : vector<1x128xf32> to vector<16x128xf32>
    %28 = arith.mulf %26, %27 : vector<16x128xf32>
    %29 = arith.mulf %17, %28 : vector<16x128xf32>
    %30 = vector.broadcast %4 : vector<1x128xf32> to vector<16x128xf32>
    %31 = arith.addf %29, %30 : vector<16x128xf32>
    %cst_13 = arith.constant 0.000000e+00 : f32
    %32 = vector.broadcast %cst_13 : f32 to vector<16x128xf32>
    %33 = arith.maximumf %31, %32 : vector<16x128xf32>
    %c3 = arith.constant 3 : index
    %c0_14 = arith.constant 0 : index
    %34 = vector.load %arg6[%c3, %c0_14] : memref<10x128xf32, #tpu.memory_space<vmem>>, vector<1x128xf32>
    %c4 = arith.constant 4 : index
    %c0_15 = arith.constant 0 : index
    %35 = vector.load %arg6[%c4, %c0_15] : memref<10x128xf32, #tpu.memory_space<vmem>>, vector<1x128xf32>
    %c5 = arith.constant 5 : index
    %c0_16 = arith.constant 0 : index
    %36 = vector.load %arg6[%c5, %c0_16] : memref<10x128xf32, #tpu.memory_space<vmem>>, vector<1x128xf32>
    %37 = arith.truncf %33 : vector<16x128xf32> to vector<16x128xbf16>
    %c0_17 = arith.constant 0 : index
    %c0_18 = arith.constant 0 : index
    %38 = vector.load %arg3[%c0_17, %c0_18] : memref<128x128xbf16, #tpu.memory_space<vmem>>, vector<128x128xbf16>
    %cst_19 = arith.constant dense<0.000000e+00> : vector<16x128xf32>
    %39 = tpu.matmul %37, %38, %cst_19 {dimension_numbers = #tpu.dot_dimension_numbers<[1], [0], [0], [1], [0, 0, 1, 1], [], []>} : vector<16x128xbf16>, vector<128x128xbf16>, vector<16x128xf32> -> vector<16x128xf32>
    %40 = vector.broadcast %34 : vector<1x128xf32> to vector<16x128xf32>
    %41 = arith.addf %39, %40 : vector<16x128xf32>
    %cst_20 = arith.constant dense<0.000000e+00> : vector<16xf32>
    %42 = vector.multi_reduction <add>, %41, %cst_20 [1] : vector<16x128xf32> to vector<16xf32>
    %43 = vector.shape_cast %42 : vector<16xf32> to vector<16x1xf32>
    %cst_21 = arith.constant 3.125000e-02 : f32
    %44 = vector.broadcast %cst_21 : f32 to vector<16x1xf32>
    %45 = arith.mulf %43, %44 : vector<16x1xf32>
    %46 = vector.broadcast %45 : vector<16x1xf32> to vector<16x128xf32>
    %47 = arith.subf %41, %46 : vector<16x128xf32>
    %48 = vector.broadcast %0 : vector<1x128xf32> to vector<16x128xf32>
    %49 = arith.mulf %47, %48 : vector<16x128xf32>
    %50 = arith.mulf %49, %49 : vector<16x128xf32>
    %cst_22 = arith.constant dense<0.000000e+00> : vector<16xf32>
    %51 = vector.multi_reduction <add>, %50, %cst_22 [1] : vector<16x128xf32> to vector<16xf32>
    %52 = vector.shape_cast %51 : vector<16xf32> to vector<16x1xf32>
    %cst_23 = arith.constant 3.125000e-02 : f32
    %53 = vector.broadcast %cst_23 : f32 to vector<16x1xf32>
    %54 = arith.mulf %52, %53 : vector<16x1xf32>
    %cst_24 = arith.constant 9.99999974E-6 : f32
    %55 = vector.broadcast %cst_24 : f32 to vector<16x1xf32>
    %56 = arith.addf %54, %55 : vector<16x1xf32>
    %57 = math.rsqrt %56 : vector<16x1xf32>
    %58 = vector.broadcast %57 : vector<16x1xf32> to vector<16x128xf32>
    %59 = vector.broadcast %35 : vector<1x128xf32> to vector<16x128xf32>
    %60 = arith.mulf %58, %59 : vector<16x128xf32>
    %61 = arith.mulf %49, %60 : vector<16x128xf32>
    %62 = vector.broadcast %36 : vector<1x128xf32> to vector<16x128xf32>
    %63 = arith.addf %61, %62 : vector<16x128xf32>
    %cst_25 = arith.constant 0.000000e+00 : f32
    %64 = vector.broadcast %cst_25 : f32 to vector<16x128xf32>
    %65 = arith.maximumf %63, %64 : vector<16x128xf32>
    %c6 = arith.constant 6 : index
    %c0_26 = arith.constant 0 : index
    %66 = vector.load %arg6[%c6, %c0_26] : memref<10x128xf32, #tpu.memory_space<vmem>>, vector<1x128xf32>
    %c7 = arith.constant 7 : index
    %c0_27 = arith.constant 0 : index
    %67 = vector.load %arg6[%c7, %c0_27] : memref<10x128xf32, #tpu.memory_space<vmem>>, vector<1x128xf32>
    %c8 = arith.constant 8 : index
    %c0_28 = arith.constant 0 : index
    %68 = vector.load %arg6[%c8, %c0_28] : memref<10x128xf32, #tpu.memory_space<vmem>>, vector<1x128xf32>
    %69 = arith.truncf %65 : vector<16x128xf32> to vector<16x128xbf16>
    %c0_29 = arith.constant 0 : index
    %c0_30 = arith.constant 0 : index
    %70 = vector.load %arg4[%c0_29, %c0_30] : memref<128x128xbf16, #tpu.memory_space<vmem>>, vector<128x128xbf16>
    %cst_31 = arith.constant dense<0.000000e+00> : vector<16x128xf32>
    %71 = tpu.matmul %69, %70, %cst_31 {dimension_numbers = #tpu.dot_dimension_numbers<[1], [0], [0], [1], [0, 0, 1, 1], [], []>} : vector<16x128xbf16>, vector<128x128xbf16>, vector<16x128xf32> -> vector<16x128xf32>
    %72 = vector.broadcast %66 : vector<1x128xf32> to vector<16x128xf32>
    %73 = arith.addf %71, %72 : vector<16x128xf32>
    %cst_32 = arith.constant dense<0.000000e+00> : vector<16xf32>
    %74 = vector.multi_reduction <add>, %73, %cst_32 [1] : vector<16x128xf32> to vector<16xf32>
    %75 = vector.shape_cast %74 : vector<16xf32> to vector<16x1xf32>
    %cst_33 = arith.constant 3.125000e-02 : f32
    %76 = vector.broadcast %cst_33 : f32 to vector<16x1xf32>
    %77 = arith.mulf %75, %76 : vector<16x1xf32>
    %78 = vector.broadcast %77 : vector<16x1xf32> to vector<16x128xf32>
    %79 = arith.subf %73, %78 : vector<16x128xf32>
    %80 = vector.broadcast %0 : vector<1x128xf32> to vector<16x128xf32>
    %81 = arith.mulf %79, %80 : vector<16x128xf32>
    %82 = arith.mulf %81, %81 : vector<16x128xf32>
    %cst_34 = arith.constant dense<0.000000e+00> : vector<16xf32>
    %83 = vector.multi_reduction <add>, %82, %cst_34 [1] : vector<16x128xf32> to vector<16xf32>
    %84 = vector.shape_cast %83 : vector<16xf32> to vector<16x1xf32>
    %cst_35 = arith.constant 3.125000e-02 : f32
    %85 = vector.broadcast %cst_35 : f32 to vector<16x1xf32>
    %86 = arith.mulf %84, %85 : vector<16x1xf32>
    %cst_36 = arith.constant 9.99999974E-6 : f32
    %87 = vector.broadcast %cst_36 : f32 to vector<16x1xf32>
    %88 = arith.addf %86, %87 : vector<16x1xf32>
    %89 = math.rsqrt %88 : vector<16x1xf32>
    %90 = vector.broadcast %89 : vector<16x1xf32> to vector<16x128xf32>
    %91 = vector.broadcast %67 : vector<1x128xf32> to vector<16x128xf32>
    %92 = arith.mulf %90, %91 : vector<16x128xf32>
    %93 = arith.mulf %81, %92 : vector<16x128xf32>
    %94 = vector.broadcast %68 : vector<1x128xf32> to vector<16x128xf32>
    %95 = arith.addf %93, %94 : vector<16x128xf32>
    %cst_37 = arith.constant 0.000000e+00 : f32
    %96 = vector.broadcast %cst_37 : f32 to vector<16x128xf32>
    %97 = arith.maximumf %95, %96 : vector<16x128xf32>
    %98 = arith.truncf %97 : vector<16x128xf32> to vector<16x128xbf16>
    %c0_38 = arith.constant 0 : index
    %c0_39 = arith.constant 0 : index
    %99 = vector.load %arg5[%c0_38, %c0_39] : memref<128x128xbf16, #tpu.memory_space<vmem>>, vector<128x128xbf16>
    %cst_40 = arith.constant dense<0.000000e+00> : vector<16x128xf32>
    %100 = tpu.matmul %98, %99, %cst_40 {dimension_numbers = #tpu.dot_dimension_numbers<[1], [0], [0], [1], [0, 0, 1, 1], [], []>} : vector<16x128xbf16>, vector<128x128xbf16>, vector<16x128xf32> -> vector<16x128xf32>
    %c0_41 = arith.constant 0 : index
    %c0_42 = arith.constant 0 : index
    %101 = vector.load %arg7[%c0_41, %c0_42] : memref<1x128xf32, #tpu.memory_space<vmem>>, vector<1x128xf32>
    %102 = vector.broadcast %101 : vector<1x128xf32> to vector<16x128xf32>
    %103 = arith.addf %100, %102 : vector<16x128xf32>
    %c0_43 = arith.constant 0 : index
    %c0_44 = arith.constant 0 : index
    %104 = vector.load %arg8[%c0_43, %c0_44] : memref<16x128xf32, #tpu.memory_space<vmem>>, vector<16x128xf32>
    tpu.vector_store %arg8[%c0_43, %c0_44], %103 {strides = array<i32>} : memref<16x128xf32, #tpu.memory_space<vmem>>, vector<16x128xf32>,
    return
  }
  func.func @transform_0(%arg0: i32) -> (i32, i32) {
    %c0_i32 = arith.constant 0 : i32
    %c0_i32_0 = arith.constant 0 : i32
    return %arg0, %c0_i32 : i32, i32
  }
  func.func @transform_1(%arg0: i32) -> (i32, i32) {
    %c0_i32 = arith.constant 0 : i32
    %c0_i32_0 = arith.constant 0 : i32
    %c0_i32_1 = arith.constant 0 : i32
    return %c0_i32, %c0_i32_0 : i32, i32
  }
  func.func @transform_2(%arg0: i32) -> (i32, i32) {
    %c0_i32 = arith.constant 0 : i32
    %c0_i32_0 = arith.constant 0 : i32
    %c0_i32_1 = arith.constant 0 : i32
    return %c0_i32, %c0_i32_0 : i32, i32
  }
  func.func @transform_3(%arg0: i32) -> (i32, i32) {
    %c0_i32 = arith.constant 0 : i32
    %c0_i32_0 = arith.constant 0 : i32
    %c0_i32_1 = arith.constant 0 : i32
    return %c0_i32, %c0_i32_0 : i32, i32
  }
  func.func @transform_4(%arg0: i32) -> (i32, i32) {
    %c0_i32 = arith.constant 0 : i32
    %c0_i32_0 = arith.constant 0 : i32
    %c0_i32_1 = arith.constant 0 : i32
    return %c0_i32, %c0_i32_0 : i32, i32
  }
  func.func @transform_5(%arg0: i32) -> (i32, i32) {
    %c0_i32 = arith.constant 0 : i32
    %c0_i32_0 = arith.constant 0 : i32
    %c0_i32_1 = arith.constant 0 : i32
    return %c0_i32, %c0_i32_0 : i32, i32
  }
  func.func @transform_6(%arg0: i32) -> (i32, i32) {
    %c0_i32 = arith.constant 0 : i32
    %c0_i32_0 = arith.constant 0 : i32
    %c0_i32_1 = arith.constant 0 : i32
    return %c0_i32, %c0_i32_0 : i32, i32
  }
  func.func @transform_7(%arg0: i32) -> (i32, i32) {
    %c0_i32 = arith.constant 0 : i32
    %c0_i32_0 = arith.constant 0 : i32
    return %arg0, %c0_i32 : i32, i32
  }
}

</mosaic_0001>

<bundles_post_ra>
// kernel: tpu_custom_call.1
= control target key start
LH: loop header
LB: loop body
LE: loop exit
PB: predicated region body
PF: predicated region fallthrough
CT: control target
= control target key end

     0   :  { %s1571_s0 = inlined_call_operand.vmem [shape: f32[45,16], index: 0, kind: input, shape index: {}]   ;;  %s1572_s1 = inlined_call_operand.hbm [shape: bf16[16,128], index: 1, kind: input, shape index: {}]   ;;  %s1573_s2 = inlined_call_operand.vmem [shape: bf16[128,128], index: 2, kind: input, shape index: {}]   ;;  %s1574_s3 = inlined_call_operand.hbm [shape: bf16[128,128], index: 3, kind: input, shape index: {}]   ;;  %s1575_s4 = inlined_call_operand.hbm [shape: bf16[128,128], index: 4, kind: input, shape index: {}]   ;;  %s1576_s5 = inlined_call_operand.hbm [shape: f32[10,128], index: 5, kind: input, shape index: {}]   ;;  %s1577_s6 = inlined_call_operand.vmem [shape: f32[1,128], index: 6, kind: input, shape index: {}]   ;;  %s1578_s7 = inlined_call_operand.hbm [shape: f32[45,128], index: 7, kind: output, shape index: {}]  }
   0x1   :  { %1579 = sst [smem:[#allocation16_spill]] %s1572_s1 }
   0x2   :  { %1580 = sst [smem:[#allocation17_spill]] %s1574_s3 }
   0x3   :  { %12 = vsyncpa [#allocation3], 0 }
   0x4   :  { %13 = vsyncpa [#allocation6], 0 }
   0x5   :  { %14 = vsyncpa [#allocation9], 0 }
   0x6   :  { %15 = vsyncpa [#allocation4], 0 }
   0x7   :  { %17 = vsyncpa [#allocation4 + $0x1], 0  ;;  %s1405_s24 = smov 0   ;;  %s1407_s25 = smov 0  }
   0x8   :  { %s1409_s26 = smov 0   ;;  %s1411_s27 = smov 0  }
   0x9 LB: > { %s1426_s28 = sadd.s32 4294967295, %s1353_s27   ;;  %s903_s29 = sadd.s32 4294967294, %s1353_s27   ;;  %s1353_s27 = sphi %s1411_s27, %s1592_s27   ;;  %s1349_s26 = sphi %s1409_s26, %s1591_s26   ;;  %s1345_s25 = sphi %s1407_s25, %s1590_s25   ;;  %s1341_s24 = sphi %s1405_s24, %s1589_s24  }
   0xa   : > { %s1430_s30 = sadd.s32 1, %s1353_s27   ;;  %s182_s8 = sadd.s32 1, %s1349_s26 }
   0xb   : > { %s179_s9 = ssub.s32 %s1353_s27, %s1430_s30  ;;  %p192_p0 = scmp.ne.s32.totalorder %s1349_s26, %s1345_s25 }
   0xc   : > { %p180_p1 = scmp.eq.s32.totalorder %s179_s9, 0  ;;  %p193_p2 = scmp.eq.s32.totalorder %s1426_s28, 2 }
   0xd   : > { %p198_p3 = scmp.ne.s32.totalorder %s1345_s25, %s1341_s24  ;;  %p199_p4 = scmp.eq.s32.totalorder %s903_s29, 2 }
   0xe   : > { %s1441_s10 = scalar_select %p180_p1, %s1349_s26, %s182_s8  }
   0xf   : > { %p1443_p5 = por %p193_p2, %p192_p0  ;;  %p1447_p6 = por %p199_p4, %p198_p3 }
  0x10   : > { %1581 = sst [smem:[#allocation15_spill]] %s1441_s10  ;;  %p904_p7 = scmp.ge.s32.totalorder %s1353_s27, 1 }
  0x11   : > { %p206_p8 = scmp.lt.s32.totalorder %s1353_s27, 4  ;;  %p1085_p9 = scmp.eq.s32.totalorder %s1426_s28, 0 }
  0x12   : > { %s1585_s3 = sld [smem:[#allocation17_spill]]  ;;  %s1355_s21 = smov [#allocation5]  }
  0x13   : > { %p1454_p10 = pnand %p904_p7, %p206_p8  ;;  %s1586_s1 = sld [smem:[#allocation16_spill]] }
  0x14   : > { %s236_s22 = sshll.u32 %s1355_s21, 4  ;;  %s1356_s23 = smov 64   ;;  %s237_s22 = int_to_ptr.vmem [resolvable:$true] %s236_s22 }
  0x15   : > { %p1068_p11 = pneg %p1454_p10  ;;  %s1357_s29 = smov 4  }
  0x16   : > { %s1358_s8 = smov [#allocation2]   ;;  %s248_s17 = sshll.u32 %s1575_s4, 4  ;;  %s249_s17 = int_to_ptr.hbm [resolvable:$true] %s248_s17 }
  0x17   : > { %p1468_p12 = pnand %p1085_p9, %p1068_p11  ;;  %s219_s9 = sshll.u32 %s1358_s8, 4  ;;  %s220_s9 = int_to_ptr.vmem [resolvable:$true] %s219_s9 }
  0x18   : > { %s234_s16 = sshll.u32 %s1585_s3, 4  ;;  %s1359_s3 = smov [#allocation7]   ;;  %s235_s16 = int_to_ptr.hbm [resolvable:$true] %s234_s16 }
  0x19   : > { %s217_s19 = sshll.u32 %s1586_s1, 4  ;;  %s262_s1 = sshll.u32 %s1576_s5, 4  ;;  %s218_s19 = int_to_ptr.hbm [resolvable:$true] %s217_s19  ;;  %s263_s1 = int_to_ptr.hbm [resolvable:$true] %s262_s1 }
  0x1a   : > { %1074 = dma.hbm_to_vmem [thread:$0]  (!%p1468_p12), %s235_s16, 1024, %s237_s22, [#allocation6], %s1356_s23, %s1356_s23, %s1357_s29  }
  0x1b   : > { %1071 = dma.hbm_to_vmem [thread:$0]  (!%p1468_p12), %s218_s19, 128, %s220_s9, [#allocation3], %s1356_s23, %s1356_s23, %s1357_s29  }
  0x1c   : > { %s250_s10 = sshll.u32 %s1359_s3, 4  ;;  %s1360_s16 = smov [#allocation8]   ;;  %s251_s10 = int_to_ptr.vmem [resolvable:$true] %s250_s10 }
  0x1d   : > { %1077 = dma.hbm_to_vmem [thread:$0]  (!%p1468_p12), %s249_s17, 1024, %s251_s10, [#allocation6], %s1356_s23, %s1356_s23, %s1357_s29  }
  0x1e   : > { %s264_s22 = sshll.u32 %s1360_s16, 4  ;;  %s1361_s8 = smov 128   ;;  %s265_s22 = int_to_ptr.vmem [resolvable:$true] %s264_s22 }
  0x1f   : > { %s1362_s14 = smov 8   ;;  %292 = sbr.rel (%p1454_p10) target bundleno = 1426 (0x592), region = 48 }
  0x20   : > { %1080 = dma.hbm_to_vmem [thread:$0]  (!%p1468_p12), %s263_s1, 256, %s265_s22, [#allocation9], %s1361_s8, %s1361_s8, %s1362_s14  }
  0x24   : > { %1324 = dma.done.wait (%p1085_p9), [#allocation3], 128  }
  0x25   : > { %1326 = vsyncadd (%p1085_p9), [#allocation3], 4294967168 }
  0x26   : > { %1328 = dma.done.wait (%p1085_p9), [#allocation6], 2048  }
  0x27   : > { %1330 = vsyncadd (%p1085_p9), [#allocation6], 4294965248 }
  0x28   : > { %1332 = dma.done.wait (%p1085_p9), [#allocation9], 256  }
  0x29   : > { %1334 = vsyncadd (%p1085_p9), [#allocation9], 4294967040  ;;  %s916_s1 = sshll.u32 %s1426_s28, 1  ;;  %v1024_v0 = vld [vmem:[#allocation2] sm:$0xff]  ;;  %vm364_vm0 = vcmask 130048   ;;  %v1032_v20 = vld [vmem:[%s1573_s2 + $0x38] sm:$0xff] }
  0x2a   : > { %p341_p13 = scmp.lt.s32.totalorder %s916_s1, 5  ;;  %375 = vmatpush.bf16.msra.mxu0 %v1024_v0  ;;  %v1136_v4 = vld [vmem:[#allocation8] ss:$0 sm:$0xff]  ;;  %v1504_v11 = vld [vmem:[#allocation8 + $0x9] ss:$0 sm:$0xff]  ;;  %502 = vmatpush.bf16.msra.mxu1 %v1032_v20  ;;  %v1029_v23 = vld [vmem:[%s1573_s2 + $0x20] sm:$0xff] }
  0x2b   : > { %v1031_v21 = vld [vmem:[%s1573_s2 + $0x30] sm:$0xff]  ;;  %v1030_v22 = vld [vmem:[%s1573_s2 + $0x28] sm:$0xff]  ;;  %v1028_v24 = vld [vmem:[%s1573_s2 + $0x18] sm:$0xff]  ;;  %s1049_s9 = sshll.u32 %s1426_s28, 4  ;;  %s1299_s10 = scalar_lea.hbm %s1578_s7, 48 }
  0x2c   : > { %s1594_s1 = smov (!%p341_p13, %s916_s1), 5  ;;  %v1027_v25 = vld [vmem:[%s1573_s2 + $0x10] sm:$0xff]  ;;  %v1026_v26 = vld [vmem:[%s1573_s2 + $0x8] sm:$0xff]  ;;  %v1025_v29 = vld [vmem:[%s1573_s2] sm:$0xff]  ;;  %s796_s18 = scalar_lea.hbm %s1578_s7, %s1049_s9 }
  0x2d   : > { %s917_s3 = sshll.u32 %s1594_s1, 3  ;;  %v1138_v42 = vld [vmem:[#allocation8 + $0x1] ss:$0 sm:$0xff]  ;;  %v1139_v50 = vld [vmem:[#allocation8 + $0x2] ss:$0 sm:$0xff]  ;;  %s799_s22 = sshll.u32 %s796_s18, 4  ;;  %s800_s22 = int_to_ptr.hbm [resolvable:$true] %s799_s22 }
  0x2e   : > { %s344_s19 = scalar_lea.vmem %s1571_s0, %s917_s3  ;;  %503 = vmatpush.bf16.msra.mxu1 %v1031_v21  ;;  %v1140_v59 = vld [vmem:[#allocation8 + $0x3] ss:$0 sm:$0xff]  ;;  %s1293_s14 = sshra.s32 %s800_s22, 4  ;;  %s1294_s14 = int_to_ptr.hbm [resolvable:$true] %s1293_s14 }
  0x2f   : > { %v349_v1 = vld [vmem:[%s344_s19] sm:$0xff]  ;;  %v350_v2 = vld [vmem:[%s344_s19 + $0x8] sm:$0xff]  ;;  %s337_s19 = sand.u32 1, %s1345_s25   ;;  %s1295_s28 = scalar_lea.hbm %s1294_s14, 16 }
  0x30   : > { %v354_v3 = vpack.c.bf16 %v350_v2, %v349_v1  ;;  %v1033_v20 = vld [vmem:[#allocation5] sm:$0xff]  ;;  %s915_s20 = sshll.u32 %s337_s19, 4  ;;  %s785_s8 = scalar_lea.sflag [#allocation4], %s337_s19 }
  0x31   : > { %s339_s21 = scalar_lea.vmem [#allocation10], %s915_s20  ;;  %p1296_p0 = scmp.ne.s32.totalorder %s1294_s14, %s1295_s28 }
  0x32   : > { %922 = vmatmul.msk.bf16.vlgmr.msra.gmra.mxu0 %vm364_vm0, %v354_v3  ;;  %504 = vmatpush.bf16.msra.mxu1 %v1030_v22  ;;  %s797_s16 = sshll.u32 %s339_s21, 4  ;;  %p1300_p3 = scmp.lt.s32.totalorder %s1294_s14, %s1578_s7  ;;  %s798_s16 = int_to_ptr.vmem [resolvable:$true] %s797_s16 }
  0x33   : > { %p1297_p1 = pnand %p1296_p0, %p1443_p5  ;;  %p1301_p4 = scmp.lt.s32.totalorder %s1299_s10, %s1295_s28 }
  0x35   : > { %p1298_p2 = pneg %p1297_p1  ;;  %p1302_p7 = por %p1301_p4, %p1300_p3 }
  0x36   : > { %505 = vmatpush.bf16.msra.mxu1 %v1029_v23 }
  0x37   : > { %p1303_p8 = pnand %p1302_p7, %p1298_p2 }
  0x3a   : > { %506 = vmatpush.bf16.msra.mxu1 %v1028_v24 }
  0x3e   : > { %507 = vmatpush.bf16.msra.mxu1 %v1027_v25 }
  0x42   : > { %508 = vmatpush.bf16.msra.mxu1 %v1026_v26 }
  0x46   : > { %509 = vmatpush.bf16.msra.mxu1 %v1025_v29 }
  0xaf   : > { %v377_v5 = vpop.f32.mrf.mxu0 }
  0xb0   : > { %v378_v6 = vadd.f32 %v1136_v4, %v377_v5 }
  0xb2   : > { %382 = vadd.xlane.f32.xlu0 %v378_v6 }
  0xb7   : > { %v379_v7 = vpop.f32.mrf.mxu0 }
  0xb8   : > { %v380_v8 = vadd.f32 %v1136_v4, %v379_v7 }
  0xba   : > { %384 = vadd.xlane.f32.xlu0 %v380_v8 }
 0x125   : > { %v383_v9 = vpop.xlane.xlu0 %382 }
 0x126   : > { %v386_v10 = vmul.f32 0.03125, %v383_v9 }
 0x128   : > { %v388_v12 = vsub.f32 %v378_v6, %v386_v10  ;;  %v1040_v10 = vld [vmem:[#allocation5 + $0x38] sm:$0xff] }
 0x129   : > { %635 = vmatpush.bf16.msra.mxu2 %v1040_v10  ;;  %v1041_v10 = vld [vmem:[#allocation7] sm:$0xff] }
 0x12a   : > { %v391_v13 = vmul.f32 %v1504_v11, %v388_v12  ;;  %v1039_v12 = vld [vmem:[#allocation5 + $0x30] sm:$0xff] }
 0x12c   : > { %v393_v14 = vmul.f32 %v391_v13, %v391_v13 }
 0x12d   : > { %v385_v15 = vpop.xlane.xlu0 %384  ;;  %636 = vmatpush.bf16.msra.mxu2 %v1039_v12 }
 0x12e   : > { %v387_v16 = vmul.f32 0.03125, %v385_v15  ;;  %395 = vadd.xlane.f32.xlu1 %v393_v14  ;;  %v1037_v14 = vld [vmem:[#allocation5 + $0x20] sm:$0xff]  ;;  %v1036_v15 = vld [vmem:[#allocation5 + $0x18] sm:$0xff] }
 0x130   : > { %v389_v17 = vsub.f32 %v380_v8, %v387_v16  ;;  %v1035_v16 = vld [vmem:[#allocation5 + $0x10] sm:$0xff] }
 0x132   : > { %v392_v18 = vmul.f32 %v1504_v11, %v389_v17  ;;  %v1034_v17 = vld [vmem:[#allocation5 + $0x8] sm:$0xff] }
 0x134   : > { %v394_v19 = vmul.f32 %v392_v18, %v392_v18 }
 0x136   : > { %397 = vadd.xlane.f32.xlu1 %v394_v19 }
 0x1a1   : > { %v396_v27 = vpop.xlane.xlu1 %395 }
 0x1a2   : > { %v399_v28 = vmul.f32 0.03125, %v396_v27 }
 0x1a4   : > { %v401_v30 = vadd.f32 1e-05, %v399_v28 }
 0x1a6   : > { %1147 = vrsqrt.f32 %v401_v30  ;;  %vm409_vm2 = vweird.f32 %v401_v30 }
 0x1a9   : > { %v398_v31 = vpop.xlane.xlu1 %397 }
 0x1aa   : > { %v400_v32 = vmul.f32 0.03125, %v398_v31 }
 0x1ac   : > { %v1148_v33 = vpop.eup %1147  ;;  %v402_v34 = vadd.f32 1e-05, %v400_v32 }
 0x1ad   : > { %v404_v35 = vmul.f32 %v1148_v33, %v401_v30  ;;  %vm410_vm1 = vweird.f32 %v1148_v33 }
 0x1ae   : > { %1149 = vrsqrt.f32 %v402_v34  ;;  %vm411_vm3 = vmor %vm409_vm2, %vm410_vm1  ;;  %vm419_vm5 = vweird.f32 %v402_v34 }
 0x1af   : > { %v405_v36 = vmul.f32 %v1148_v33, %v404_v35 }
 0x1b1   : > { %v406_v37 = vmul.f32 0.5, %v405_v36 }
 0x1b3   : > { %v407_v38 = vsub.f32 1.5, %v406_v37 }
 0x1b4   : > { %v1150_v39 = vpop.eup %1149 }
 0x1b5   : > { %v408_v40 = vmul.f32 %v1148_v33, %v407_v38  ;;  %v414_v41 = vmul.f32 %v1150_v39, %v402_v34  ;;  %vm420_vm4 = vweird.f32 %v1150_v39 }
 0x1b6   : > { %vm421_vm6 = vmor %vm419_vm5, %vm420_vm4 }
 0x1b7   : > { %v412_v43 = vsel %vm411_vm3, %v1148_v33, %v408_v40  ;;  %v415_v44 = vmul.f32 %v1150_v39, %v414_v41  ;;  %v1141_v33 = vld [vmem:[#allocation8 + $0x4] ss:$0 sm:$0xff]  ;;  %v1142_v41 = vld [vmem:[#allocation8 + $0x5] ss:$0 sm:$0xff] }
 0x1b8   : > { %v424_v46 = vmul.f32 %v1138_v42, %v412_v43 }
 0x1b9   : > { %v416_v45 = vmul.f32 0.5, %v415_v44 }
 0x1ba   : > { %v426_v49 = vmul.f32 %v424_v46, %v391_v13  ;;  %v1038_v13 = vld [vmem:[#allocation5 + $0x28] sm:$0xff] }
 0x1bb   : > { %v417_v47 = vsub.f32 1.5, %v416_v45  ;;  %637 = vmatpush.bf16.msra.mxu2 %v1038_v13 }
 0x1bc   : > { %v429_v54 = vadd.f32 %v1139_v50, %v426_v49 }
 0x1bd   : > { %v418_v48 = vmul.f32 %v1150_v39, %v417_v47 }
 0x1be   : > { %v431_v56 = vmax.f32 %v429_v54, 0.0 }
 0x1bf   : > { %v422_v51 = vsel %vm421_vm6, %v1150_v39, %v418_v48  ;;  %638 = vmatpush.bf16.msra.mxu2 %v1037_v14 }
 0x1c0   : > { %v425_v52 = vmul.f32 %v1138_v42, %v422_v51 }
 0x1c2   : > { %v427_v53 = vmul.f32 %v425_v52, %v392_v18 }
 0x1c3   : > { %639 = vmatpush.bf16.msra.mxu2 %v1036_v15 }
 0x1c4   : > { %v430_v55 = vadd.f32 %v1139_v50, %v427_v53  ;;  %v1143_v50 = vld [vmem:[#allocation8 + $0x6] ss:$0 sm:$0xff] }
 0x1c6   : > { %v432_v57 = vmax.f32 %v430_v55, 0.0 }
 0x1c7   : > { %640 = vmatpush.bf16.msra.mxu2 %v1035_v16 }
 0x1c8   : > { %v436_v58 = vpack.c.bf16 %v432_v57, %v431_v56 }
 0x1ca   : > { %510 = vmatmul.bf16.vlgmr.msra.gmra.mxu1 %v436_v58 }
 0x1cb   : > { %641 = vmatpush.bf16.msra.mxu2 %v1034_v17 }
 0x1cf   : > { %642 = vmatpush.bf16.msra.mxu2 %v1033_v20 }
 0x247   : > { %v511_v60 = vpop.f32.mrf.mxu1 }
 0x248   : > { %v512_v61 = vadd.f32 %v1140_v59, %v511_v60 }
 0x24a   : > { %516 = vadd.xlane.f32.xlu2 %v512_v61 }
 0x24f   : > { %v513_v62 = vpop.f32.mrf.mxu1 }
 0x250   : > { %v514_v63 = vadd.f32 %v1140_v59, %v513_v62 }
 0x252   : > { %518 = vadd.xlane.f32.xlu2 %v514_v63 }
 0x2bd   : > { %v517_v0 = vpop.xlane.xlu2 %516 }
 0x2be   : > { %v520_v1 = vmul.f32 0.03125, %v517_v0 }
 0x2c0   : > { %v522_v2 = vsub.f32 %v512_v61, %v520_v1  ;;  %v1048_v1 = vld [vmem:[#allocation7 + $0x38] sm:$0xff] }
 0x2c1   : > { %768 = vmatpush.bf16.msra.mxu3 %v1048_v1 }
 0x2c2   : > { %v524_v3 = vmul.f32 %v1504_v11, %v522_v2  ;;  %v1047_v2 = vld [vmem:[#allocation7 + $0x30] sm:$0xff] }
 0x2c4   : > { %v526_v4 = vmul.f32 %v524_v3, %v524_v3 }
 0x2c5   : > { %v519_v5 = vpop.xlane.xlu2 %518  ;;  %769 = vmatpush.bf16.msra.mxu3 %v1047_v2 }
 0x2c6   : > { %v521_v6 = vmul.f32 0.03125, %v519_v5  ;;  %528 = vadd.xlane.f32.xlu0 %v526_v4  ;;  %v1045_v4 = vld [vmem:[#allocation7 + $0x20] sm:$0xff]  ;;  %v1044_v5 = vld [vmem:[#allocation7 + $0x18] sm:$0xff] }
 0x2c8   : > { %v523_v7 = vsub.f32 %v514_v63, %v521_v6  ;;  %v1043_v6 = vld [vmem:[#allocation7 + $0x10] sm:$0xff] }
 0x2ca   : > { %v525_v8 = vmul.f32 %v1504_v11, %v523_v7  ;;  %v1042_v7 = vld [vmem:[#allocation7 + $0x8] sm:$0xff] }
 0x2cc   : > { %v527_v9 = vmul.f32 %v525_v8, %v525_v8 }
 0x2ce   : > { %530 = vadd.xlane.f32.xlu1 %v527_v9 }
 0x339   : > { %v529_v18 = vpop.xlane.xlu0 %528 }
 0x33a   : > { %v532_v19 = vmul.f32 0.03125, %v529_v18 }
 0x33c   : > { %v534_v21 = vadd.f32 1e-05, %v532_v19 }
 0x33e   : > { %1151 = vrsqrt.f32 %v534_v21  ;;  %vm542_vm8 = vweird.f32 %v534_v21 }
 0x341   : > { %v531_v22 = vpop.xlane.xlu1 %530 }
 0x342   : > { %v533_v23 = vmul.f32 0.03125, %v531_v22 }
 0x344   : > { %v1152_v24 = vpop.eup %1151  ;;  %v535_v25 = vadd.f32 1e-05, %v533_v23  ;;  %v1144_v23 = vld [vmem:[#allocation8 + $0x7] ss:$0 sm:$0xff] }
 0x345   : > { %v537_v26 = vmul.f32 %v1152_v24, %v534_v21  ;;  %vm543_vm7 = vweird.f32 %v1152_v24 }
 0x346   : > { %1153 = vrsqrt.f32 %v535_v25  ;;  %vm544_vm9 = vmor %vm542_vm8, %vm543_vm7  ;;  %vm552_vm11 = vweird.f32 %v535_v25 }
 0x347   : > { %v538_v27 = vmul.f32 %v1152_v24, %v537_v26 }
 0x349   : > { %v539_v28 = vmul.f32 0.5, %v538_v27 }
 0x34b   : > { %v540_v29 = vsub.f32 1.5, %v539_v28 }
 0x34c   : > { %v1154_v30 = vpop.eup %1153 }
 0x34d   : > { %v541_v31 = vmul.f32 %v1152_v24, %v540_v29  ;;  %v547_v32 = vmul.f32 %v1154_v30, %v535_v25  ;;  %vm553_vm10 = vweird.f32 %v1154_v30 }
 0x34e   : > { %vm554_vm12 = vmor %vm552_vm11, %vm553_vm10 }
 0x34f   : > { %v545_v34 = vsel %vm544_vm9, %v1152_v24, %v541_v31  ;;  %v548_v35 = vmul.f32 %v1154_v30, %v547_v32  ;;  %v1145_v31 = vld [vmem:[#allocation8 + $0x8] ss:$0 sm:$0xff] }
 0x350   : > { %v557_v37 = vmul.f32 %v1141_v33, %v545_v34 }
 0x351   : > { %v549_v36 = vmul.f32 0.5, %v548_v35 }
 0x352   : > { %v559_v40 = vmul.f32 %v557_v37, %v524_v3  ;;  %v1046_v3 = vld [vmem:[#allocation7 + $0x28] sm:$0xff] }
 0x353   : > { %v550_v38 = vsub.f32 1.5, %v549_v36  ;;  %770 = vmatpush.bf16.msra.mxu3 %v1046_v3 }
 0x354   : > { %v562_v45 = vadd.f32 %v1142_v41, %v559_v40  ;;  %v1146_v40 = vld [vmem:[%s1577_s6] ss:$0 sm:$0xff] }
 0x355   : > { %v551_v39 = vmul.f32 %v1154_v30, %v550_v38 }
 0x356   : > { %v564_v47 = vmax.f32 %v562_v45, 0.0 }
 0x357   : > { %v555_v42 = vsel %vm554_vm12, %v1154_v30, %v551_v39  ;;  %771 = vmatpush.bf16.msra.mxu3 %v1045_v4 }
 0x358   : > { %v558_v43 = vmul.f32 %v1141_v33, %v555_v42 }
 0x35a   : > { %v560_v44 = vmul.f32 %v558_v43, %v525_v8 }
 0x35b   : > { %772 = vmatpush.bf16.msra.mxu3 %v1044_v5 }
 0x35c   : > { %v563_v46 = vadd.f32 %v1142_v41, %v560_v44 }
 0x35e   : > { %v565_v48 = vmax.f32 %v563_v46, 0.0 }
 0x35f   : > { %773 = vmatpush.bf16.msra.mxu3 %v1043_v6 }
 0x360   : > { %v569_v49 = vpack.c.bf16 %v565_v48, %v564_v47 }
 0x362   : > { %643 = vmatmul.bf16.vlgmr.msra.gmra.mxu2 %v569_v49 }
 0x363   : > { %774 = vmatpush.bf16.msra.mxu3 %v1042_v7 }
 0x367   : > { %775 = vmatpush.bf16.msra.mxu3 %v1041_v10 }
 0x3e5   : > { %v644_v51 = vpop.f32.mrf.mxu2 }
 0x3e6   : > { %v645_v52 = vadd.f32 %v1143_v50, %v644_v51 }
 0x3e8   : > { %649 = vadd.xlane.f32.xlu2 %v645_v52 }
 0x3ed   : > { %v646_v53 = vpop.f32.mrf.mxu2 }
 0x3ee   : > { %v647_v54 = vadd.f32 %v1143_v50, %v646_v53 }
 0x3f0   : > { %651 = vadd.xlane.f32.xlu0 %v647_v54 }
 0x45b   : > { %v650_v55 = vpop.xlane.xlu2 %649 }
 0x45c   : > { %v653_v56 = vmul.f32 0.03125, %v650_v55 }
 0x45e   : > { %v655_v57 = vsub.f32 %v645_v52, %v653_v56 }
 0x460   : > { %v657_v58 = vmul.f32 %v1504_v11, %v655_v57 }
 0x462   : > { %v659_v59 = vmul.f32 %v657_v58, %v657_v58 }
 0x463   : > { %v652_v60 = vpop.xlane.xlu0 %651 }
 0x464   : > { %v654_v61 = vmul.f32 0.03125, %v652_v60  ;;  %661 = vadd.xlane.f32.xlu1 %v659_v59 }
 0x466   : > { %v656_v62 = vsub.f32 %v647_v54, %v654_v61 }
 0x468   : > { %v658_v63 = vmul.f32 %v1504_v11, %v656_v62 }
 0x46a   : > { %v660_v0 = vmul.f32 %v658_v63, %v658_v63 }
 0x46c   : > { %663 = vadd.xlane.f32.xlu2 %v660_v0 }
 0x4d7   : > { %v662_v8 = vpop.xlane.xlu1 %661 }
 0x4d8   : > { %v665_v9 = vmul.f32 0.03125, %v662_v8 }
 0x4da   : > { %v667_v11 = vadd.f32 1e-05, %v665_v9 }
 0x4dc   : > { %1155 = vrsqrt.f32 %v667_v11  ;;  %vm675_vm14 = vweird.f32 %v667_v11 }
 0x4df   : > { %v664_v12 = vpop.xlane.xlu2 %663 }
 0x4e0   : > { %v666_v13 = vmul.f32 0.03125, %v664_v12 }
 0x4e2   : > { %v1156_v14 = vpop.eup %1155  ;;  %v668_v15 = vadd.f32 1e-05, %v666_v13 }
 0x4e3   : > { %v670_v16 = vmul.f32 %v1156_v14, %v667_v11  ;;  %vm676_vm13 = vweird.f32 %v1156_v14 }
 0x4e4   : > { %1157 = vrsqrt.f32 %v668_v15  ;;  %vm677_vm15 = vmor %vm675_vm14, %vm676_vm13  ;;  %vm685_vm1 = vweird.f32 %v668_v15 }
 0x4e5   : > { %v671_v17 = vmul.f32 %v1156_v14, %v670_v16 }
 0x4e7   : > { %v672_v18 = vmul.f32 0.5, %v671_v17 }
 0x4e9   : > { %v673_v19 = vsub.f32 1.5, %v672_v18 }
 0x4ea   : > { %v1158_v20 = vpop.eup %1157 }
 0x4eb   : > { %v674_v21 = vmul.f32 %v1156_v14, %v673_v19  ;;  %v680_v22 = vmul.f32 %v1158_v20, %v668_v15  ;;  %vm686_vm0 = vweird.f32 %v1158_v20 }
 0x4ec   : > { %vm687_vm2 = vmor %vm685_vm1, %vm686_vm0 }
 0x4ed   : > { %v678_v24 = vsel %vm677_vm15, %v1156_v14, %v674_v21  ;;  %v681_v25 = vmul.f32 %v1158_v20, %v680_v22 }
 0x4ee   : > { %v690_v27 = vmul.f32 %v1144_v23, %v678_v24 }
 0x4ef   : > { %v682_v26 = vmul.f32 0.5, %v681_v25 }
 0x4f0   : > { %v692_v30 = vmul.f32 %v690_v27, %v657_v58 }
 0x4f1   : > { %v683_v28 = vsub.f32 1.5, %v682_v26 }
 0x4f2   : > { %v695_v35 = vadd.f32 %v1145_v31, %v692_v30 }
 0x4f3   : > { %v684_v29 = vmul.f32 %v1158_v20, %v683_v28 }
 0x4f4   : > { %v697_v37 = vmax.f32 %v695_v35, 0.0 }
 0x4f5   : > { %v688_v32 = vsel %vm687_vm2, %v1158_v20, %v684_v29 }
 0x4f6   : > { %v691_v33 = vmul.f32 %v1144_v23, %v688_v32 }
 0x4f8   : > { %v693_v34 = vmul.f32 %v691_v33, %v658_v63 }
 0x4fa   : > { %v696_v36 = vadd.f32 %v1145_v31, %v693_v34 }
 0x4fc   : > { %v698_v38 = vmax.f32 %v696_v36, 0.0 }
 0x4fe   : > { %v699_v39 = vpack.c.bf16 %v698_v38, %v697_v37 }
 0x500   : > { %776 = vmatmul.bf16.vlgmr.msra.gmra.mxu3 %v699_v39 }
 0x583   : > { %v777_v41 = vpop.f32.mrf.mxu3 }
 0x584   : > { %v778_v42 = vadd.f32 %v1146_v40, %v777_v41 }
 0x586   : > { %782 = vst [vmem:[%s339_s21] sm:$0xff] %v778_v42 }
 0x58b   : > { %v779_v43 = vpop.f32.mrf.mxu3 }
 0x58c   : > { %v780_v44 = vadd.f32 %v1146_v40, %v779_v43 }
 0x58e   : > { %783 = vst [vmem:[%s339_s21 + $0x8] sm:$0xff] %v780_v44 }
 0x58f   : > { %1306 = shalt.err (!%p1303_p8)
}
 0x590   : > { %s1363_s19 = smov 128   ;;  %s1364_s23 = smov 8  }
 0x591   : > { %1066 = dma.vmem_to_hbm [thread:$0]  (%p1443_p5), %s798_s16, 256, %s800_s22, %s785_s8, %s1363_s19, %s1363_s19, %s1364_s23  }
 0x592 PF: > { %p1093_p9 = scmp.ge.s32.totalorder %s1353_s27, 2  ;;  %s814_s29 = sand.u32 1, %s1341_s24  }
 0x593   : > { %s815_s9 = scalar_lea.sflag [#allocation4], %s814_s29 }
 0x594   : > { %p1082_p10 = pnand %p1093_p9, %p1447_p6 }
 0x596   : > { %p1083_p11 = pneg %p1082_p10 }
 0x598   : > { %1336 = dma.done.wait (%p1083_p11), %s815_s9, 256  }
 0x599   : > { %1338 = vsyncadd (%p1083_p11), %s815_s9, 4294967040  ;;  %s1588_s15 = sld [smem:[#allocation15_spill]]  ;;  %p20_p12 = scmp.ge.s32.totalorder %s1430_s30, 5  }
 0x59a   : > { %s1589_s24 = smov %s1345_s25  ;;  %s1590_s25 = smov %s1349_s26 }
 0x59b   : > { %s1592_s27 = smov %s1430_s30  ;;  %22 = sbr.rel (!%p20_p12) target bundleno = 9 (0x9), region = 100 }
 0x59f   : > { %s1591_s26 = smov %s1588_s15 }
 0x5a0   :  { %821 = vsyncpa [#allocation3], 1 }
 0x5a1   :  { %823 = vsyncpa [#allocation3 + $0x1], 1 }
 0x5a2   :  { %824 = vsyncpa [#allocation6], 1 }
 0x5a3   :  { %825 = vsyncpa [#allocation9], 1 }
 0x5a4   :  { %826 = vsyncpa [#allocation4], 1 }
 0x5a5   :  { %828 = vsyncpa [#allocation4 + $0x1], 1 }

// kernel: tpu_custom_call.1
= control target key start
LH: loop header
LB: loop body
LE: loop exit
PB: predicated region body
PF: predicated region fallthrough
CT: control target
= control target key end

     0   :  { %s1571_s0 = inlined_call_operand.vmem [shape: f32[45,16], index: 0, kind: input, shape index: {}]   ;;  %s1572_s1 = inlined_call_operand.hbm [shape: bf16[16,128], index: 1, kind: input, shape index: {}]   ;;  %s1573_s2 = inlined_call_operand.vmem [shape: bf16[128,128], index: 2, kind: input, shape index: {}]   ;;  %s1574_s3 = inlined_call_operand.hbm [shape: bf16[128,128], index: 3, kind: input, shape index: {}]   ;;  %s1575_s4 = inlined_call_operand.hbm [shape: bf16[128,128], index: 4, kind: input, shape index: {}]   ;;  %s1576_s5 = inlined_call_operand.hbm [shape: f32[10,128], index: 5, kind: input, shape index: {}]   ;;  %s1577_s6 = inlined_call_operand.vmem [shape: f32[1,128], index: 6, kind: input, shape index: {}]   ;;  %s1578_s7 = inlined_call_operand.hbm [shape: f32[45,128], index: 7, kind: output, shape index: {}]  }
   0x1   :  { %1579 = sst [smem:[#allocation16_spill]] %s1572_s1 }
   0x2   :  { %1580 = sst [smem:[#allocation17_spill]] %s1574_s3 }
   0x3   :  { %12 = vsyncpa [#allocation3], 0 }
   0x4   :  { %13 = vsyncpa [#allocation6], 0 }
   0x5   :  { %14 = vsyncpa [#allocation9], 0 }
   0x6   :  { %15 = vsyncpa [#allocation4], 0 }
   0x7   :  { %17 = vsyncpa [#allocation4 + $0x1], 0  ;;  %s1405_s24 = smov 0   ;;  %s1407_s25 = smov 0  }
   0x8   :  { %s1409_s26 = smov 0   ;;  %s1411_s27 = smov 0  }
   0x9 LB: > { %s1426_s28 = sadd.s32 4294967295, %s1353_s27   ;;  %s903_s29 = sadd.s32 4294967294, %s1353_s27   ;;  %s1353_s27 = sphi %s1411_s27, %s1592_s27   ;;  %s1349_s26 = sphi %s1409_s26, %s1591_s26   ;;  %s1345_s25 = sphi %s1407_s25, %s1590_s25   ;;  %s1341_s24 = sphi %s1405_s24, %s1589_s24  }
   0xa   : > { %s1430_s30 = sadd.s32 1, %s1353_s27   ;;  %s182_s8 = sadd.s32 1, %s1349_s26 }
   0xb   : > { %s179_s9 = ssub.s32 %s1353_s27, %s1430_s30  ;;  %p192_p0 = scmp.ne.s32.totalorder %s1349_s26, %s1345_s25 }
   0xc   : > { %p180_p1 = scmp.eq.s32.totalorder %s179_s9, 0  ;;  %p193_p2 = scmp.eq.s32.totalorder %s1426_s28, 2 }
   0xd   : > { %p198_p3 = scmp.ne.s32.totalorder %s1345_s25, %s1341_s24  ;;  %p199_p4 = scmp.eq.s32.totalorder %s903_s29, 2 }
   0xe   : > { %s1441_s10 = scalar_select %p180_p1, %s1349_s26, %s182_s8  }
   0xf   : > { %p1443_p5 = por %p193_p2, %p192_p0  ;;  %p1447_p6 = por %p199_p4, %p198_p3 }
  0x10   : > { %1581 = sst [smem:[#allocation15_spill]] %s1441_s10  ;;  %p904_p7 = scmp.ge.s32.totalorder %s1353_s27, 1 }
  0x11   : > { %p206_p8 = scmp.lt.s32.totalorder %s1353_s27, 4  ;;  %p1085_p9 = scmp.eq.s32.totalorder %s1426_s28, 0 }
  0x12   : > { %s1585_s3 = sld [smem:[#allocation17_spill]]  ;;  %s1355_s21 = smov [#allocation5]  }
  0x13   : > { %p1454_p10 = pnand %p904_p7, %p206_p8  ;;  %s1586_s1 = sld [smem:[#allocation16_spill]] }
  0x14   : > { %s236_s22 = sshll.u32 %s1355_s21, 4  ;;  %s1356_s23 = smov 64   ;;  %s237_s22 = int_to_ptr.vmem [resolvable:$true] %s236_s22 }
  0x15   : > { %p1068_p11 = pneg %p1454_p10  ;;  %s1357_s29 = smov 4  }
  0x16   : > { %s1358_s8 = smov [#allocation2]   ;;  %s248_s17 = sshll.u32 %s1575_s4, 4  ;;  %s249_s17 = int_to_ptr.hbm [resolvable:$true] %s248_s17 }
  0x17   : > { %p1468_p12 = pnand %p1085_p9, %p1068_p11  ;;  %s219_s9 = sshll.u32 %s1358_s8, 4  ;;  %s220_s9 = int_to_ptr.vmem [resolvable:$true] %s219_s9 }
  0x18   : > { %s234_s16 = sshll.u32 %s1585_s3, 4  ;;  %s1359_s3 = smov [#allocation7]   ;;  %s235_s16 = int_to_ptr.hbm [resolvable:$true] %s234_s16 }
  0x19   : > { %s217_s19 = sshll.u32 %s1586_s1, 4  ;;  %s262_s1 = sshll.u32 %s1576_s5, 4  ;;  %s218_s19 = int_to_ptr.hbm [resolvable:$true] %s217_s19  ;;  %s263_s1 = int_to_ptr.hbm [resolvable:$true] %s262_s1 }
  0x1a   : > { %1074 = dma.hbm_to_vmem [thread:$0]  (!%p1468_p12), %s235_s16, 1024, %s237_s22, [#allocation6], %s1356_s23, %s1356_s23, %s1357_s29  }
  0x1b   : > { %1071 = dma.hbm_to_vmem [thread:$0]  (!%p1468_p12), %s218_s19, 128, %s220_s9, [#allocation3], %s1356_s23, %s1356_s23, %s1357_s29  }
  0x1c   : > { %s250_s10 = sshll.u32 %s1359_s3, 4  ;;  %s1360_s16 = smov [#allocation8]   ;;  %s251_s10 = int_to_ptr.vmem [resolvable:$true] %s250_s10 }
  0x1d   : > { %1077 = dma.hbm_to_vmem [thread:$0]  (!%p1468_p12), %s249_s17, 1024, %s251_s10, [#allocation6], %s1356_s23, %s1356_s23, %s1357_s29  }
  0x1e   : > { %s264_s22 = sshll.u32 %s1360_s16, 4  ;;  %s1361_s8 = smov 128   ;;  %s265_s22 = int_to_ptr.vmem [resolvable:$true] %s264_s22 }
  0x1f   : > { %s1362_s14 = smov 8   ;;  %292 = sbr.rel (%p1454_p10) target bundleno = 1426 (0x592), region = 48 }
  0x20   : > { %1080 = dma.hbm_to_vmem [thread:$0]  (!%p1468_p12), %s263_s1, 256, %s265_s22, [#allocation9], %s1361_s8, %s1361_s8, %s1362_s14  }
  0x24   : > { %1324 = dma.done.wait (%p1085_p9), [#allocation3], 128  }
  0x25   : > { %1326 = vsyncadd (%p1085_p9), [#allocation3], 4294967168 }
  0x26   : > { %1328 = dma.done.wait (%p1085_p9), [#allocation6], 2048  }
  0x27   : > { %1330 = vsyncadd (%p1085_p9), [#allocation6], 4294965248 }
  0x28   : > { %1332 = dma.done.wait (%p1085_p9), [#allocation9], 256  }
  0x29   : > { %1334 = vsyncadd (%p1085_p9), [#allocation9], 4294967040  ;;  %s916_s1 = sshll.u32 %s1426_s28, 1  ;;  %v1024_v0 = vld [vmem:[#allocation2] sm:$0xff]  ;;  %vm364_vm0 = vcmask 130048   ;;  %v1032_v20 = vld [vmem:[%s1573_s2 + $0x38] sm:$0xff] }
  0x2a   : > { %p341_p13 = scmp.lt.s32.totalorder %s916_s1, 5  ;;  %375 = vmatpush.bf16.msra.mxu0 %v1024_v0  ;;  %v1136_v4 = vld [vmem:[#allocation8] ss:$0 sm:$0xff]  ;;  %v1504_v11 = vld [vmem:[#allocation8 + $0x9] ss:$0 sm:$0xff]  ;;  %502 = vmatpush.bf16.msra.mxu1 %v1032_v20  ;;  %v1029_v23 = vld [vmem:[%s1573_s2 + $0x20] sm:$0xff] }
  0x2b   : > { %v1031_v21 = vld [vmem:[%s1573_s2 + $0x30] sm:$0xff]  ;;  %v1030_v22 = vld [vmem:[%s1573_s2 + $0x28] sm:$0xff]  ;;  %v1028_v24 = vld [vmem:[%s1573_s2 + $0x18] sm:$0xff]  ;;  %s1049_s9 = sshll.u32 %s1426_s28, 4  ;;  %s1299_s10 = scalar_lea.hbm %s1578_s7, 48 }
  0x2c   : > { %s1594_s1 = smov (!%p341_p13, %s916_s1), 5  ;;  %v1027_v25 = vld [vmem:[%s1573_s2 + $0x10] sm:$0xff]  ;;  %v1026_v26 = vld [vmem:[%s1573_s2 + $0x8] sm:$0xff]  ;;  %v1025_v29 = vld [vmem:[%s1573_s2] sm:$0xff]  ;;  %s796_s18 = scalar_lea.hbm %s1578_s7, %s1049_s9 }
  0x2d   : > { %s917_s3 = sshll.u32 %s1594_s1, 3  ;;  %v1138_v42 = vld [vmem:[#allocation8 + $0x1] ss:$0 sm:$0xff]  ;;  %v1139_v50 = vld [vmem:[#allocation8 + $0x2] ss:$0 sm:$0xff]  ;;  %s799_s22 = sshll.u32 %s796_s18, 4  ;;  %s800_s22 = int_to_ptr.hbm [resolvable:$true] %s799_s22 }
  0x2e   : > { %s344_s19 = scalar_lea.vmem %s1571_s0, %s917_s3  ;;  %503 = vmatpush.bf16.msra.mxu1 %v1031_v21  ;;  %v1140_v59 = vld [vmem:[#allocation8 + $0x3] ss:$0 sm:$0xff]  ;;  %s1293_s14 = sshra.s32 %s800_s22, 4  ;;  %s1294_s14 = int_to_ptr.hbm [resolvable:$true] %s1293_s14 }
  0x2f   : > { %v349_v1 = vld [vmem:[%s344_s19] sm:$0xff]  ;;  %v350_v2 = vld [vmem:[%s344_s19 + $0x8] sm:$0xff]  ;;  %s337_s19 = sand.u32 1, %s1345_s25   ;;  %s1295_s28 = scalar_lea.hbm %s1294_s14, 16 }
  0x30   : > { %v354_v3 = vpack.c.bf16 %v350_v2, %v349_v1  ;;  %v1033_v20 = vld [vmem:[#allocation5] sm:$0xff]  ;;  %s915_s20 = sshll.u32 %s337_s19, 4  ;;  %s785_s8 = scalar_lea.sflag [#allocation4], %s337_s19 }
  0x31   : > { %s339_s21 = scalar_lea.vmem [#allocation10], %s915_s20  ;;  %p1296_p0 = scmp.ne.s32.totalorder %s1294_s14, %s1295_s28 }
  0x32   : > { %922 = vmatmul.msk.bf16.vlgmr.msra.gmra.mxu0 %vm364_vm0, %v354_v3  ;;  %504 = vmatpush.bf16.msra.mxu1 %v1030_v22  ;;  %s797_s16 = sshll.u32 %s339_s21, 4  ;;  %p1300_p3 = scmp.lt.s32.totalorder %s1294_s14, %s1578_s7  ;;  %s798_s16 = int_to_ptr.vmem [resolvable:$true] %s797_s16 }
  0x33   : > { %p1297_p1 = pnand %p1296_p0, %p1443_p5  ;;  %p1301_p4 = scmp.lt.s32.totalorder %s1299_s10, %s1295_s28 }
  0x35   : > { %p1298_p2 = pneg %p1297_p1  ;;  %p1302_p7 = por %p1301_p4, %p1300_p3 }
  0x36   : > { %505 = vmatpush.bf16.msra.mxu1 %v1029_v23 }
  0x37   : > { %p1303_p8 = pnand %p1302_p7, %p1298_p2 }
  0x3a   : > { %506 = vmatpush.bf16.msra.mxu1 %v1028_v24 }
  0x3e   : > { %507 = vmatpush.bf16.msra.mxu1 %v1027_v25 }
  0x42   : > { %508 = vmatpush.bf16.msra.mxu1 %v1026_v26 }
  0x46   : > { %509 = vmatpush.bf16.msra.mxu1 %v1025_v29 }
  0xaf   : > { %v377_v5 = vpop.f32.mrf.mxu0 }
  0xb0   : > { %v378_v6 = vadd.f32 %v1136_v4, %v377_v5 }
  0xb2   : > { %382 = vadd.xlane.f32.xlu0 %v378_v6 }
  0xb7   : > { %v379_v7 = vpop.f32.mrf.mxu0 }
  0xb8   : > { %v380_v8 = vadd.f32 %v1136_v4, %v379_v7 }
  0xba   : > { %384 = vadd.xlane.f32.xlu0 %v380_v8 }
 0x125   : > { %v383_v9 = vpop.xlane.xlu0 %382 }
 0x126   : > { %v386_v10 = vmul.f32 0.03125, %v383_v9 }
 0x128   : > { %v388_v12 = vsub.f32 %v378_v6, %v386_v10  ;;  %v1040_v10 = vld [vmem:[#allocation5 + $0x38] sm:$0xff] }
 0x129   : > { %635 = vmatpush.bf16.msra.mxu2 %v1040_v10  ;;  %v1041_v10 = vld [vmem:[#allocation7] sm:$0xff] }
 0x12a   : > { %v391_v13 = vmul.f32 %v1504_v11, %v388_v12  ;;  %v1039_v12 = vld [vmem:[#allocation5 + $0x30] sm:$0xff] }
 0x12c   : > { %v393_v14 = vmul.f32 %v391_v13, %v391_v13 }
 0x12d   : > { %v385_v15 = vpop.xlane.xlu0 %384  ;;  %636 = vmatpush.bf16.msra.mxu2 %v1039_v12 }
 0x12e   : > { %v387_v16 = vmul.f32 0.03125, %v385_v15  ;;  %395 = vadd.xlane.f32.xlu1 %v393_v14  ;;  %v1037_v14 = vld [vmem:[#allocation5 + $0x20] sm:$0xff]  ;;  %v1036_v15 = vld [vmem:[#allocation5 + $0x18] sm:$0xff] }
 0x130   : > { %v389_v17 = vsub.f32 %v380_v8, %v387_v16  ;;  %v1035_v16 = vld [vmem:[#allocation5 + $0x10] sm:$0xff] }
 0x132   : > { %v392_v18 = vmul.f32 %v1504_v11, %v389_v17  ;;  %v1034_v17 = vld [vmem:[#allocation5 + $0x8] sm:$0xff] }
 0x134   : > { %v394_v19 = vmul.f32 %v392_v18, %v392_v18 }
 0x136   : > { %397 = vadd.xlane.f32.xlu1 %v394_v19 }
 0x1a1   : > { %v396_v27 = vpop.xlane.xlu1 %395 }
 0x1a2   : > { %v399_v28 = vmul.f32 0.03125, %v396_v27 }
 0x1a4   : > { %v401_v30 = vadd.f32 1e-05, %v399_v28 }
 0x1a6   : > { %1147 = vrsqrt.f32 %v401_v30  ;;  %vm409_vm2 = vweird.f32 %v401_v30 }
 0x1a9   : > { %v398_v31 = vpop.xlane.xlu1 %397 }
 0x1aa   : > { %v400_v32 = vmul.f32 0.03125, %v398_v31 }
 0x1ac   : > { %v1148_v33 = vpop.eup %1147  ;;  %v402_v34 = vadd.f32 1e-05, %v400_v32 }
 0x1ad   : > { %v404_v35 = vmul.f32 %v1148_v33, %v401_v30  ;;  %vm410_vm1 = vweird.f32 %v1148_v33 }
 0x1ae   : > { %1149 = vrsqrt.f32 %v402_v34  ;;  %vm411_vm3 = vmor %vm409_vm2, %vm410_vm1  ;;  %vm419_vm5 = vweird.f32 %v402_v34 }
 0x1af   : > { %v405_v36 = vmul.f32 %v1148_v33, %v404_v35 }
 0x1b1   : > { %v406_v37 = vmul.f32 0.5, %v405_v36 }
 0x1b3   : > { %v407_v38 = vsub.f32 1.5, %v406_v37 }
 0x1b4   : > { %v1150_v39 = vpop.eup %1149 }
 0x1b5   : > { %v408_v40 = vmul.f32 %v1148_v33, %v407_v38  ;;  %v414_v41 = vmul.f32 %v1150_v39, %v402_v34  ;;  %vm420_vm4 = vweird.f32 %v1150_v39 }
 0x1b6   : > { %vm421_vm6 = vmor %vm419_vm5, %vm420_vm4 }
 0x1b7   : > { %v412_v43 = vsel %vm411_vm3, %v1148_v33, %v408_v40  ;;  %v415_v44 = vmul.f32 %v1150_v39, %v414_v41  ;;  %v1141_v33 = vld [vmem:[#allocation8 + $0x4] ss:$0 sm:$0xff]  ;;  %v1142_v41 = vld [vmem:[#allocation8 + $0x5] ss:$0 sm:$0xff] }
 0x1b8   : > { %v424_v46 = vmul.f32 %v1138_v42, %v412_v43 }
 0x1b9   : > { %v416_v45 = vmul.f32 0.5, %v415_v44 }
 0x1ba   : > { %v426_v49 = vmul.f32 %v424_v46, %v391_v13  ;;  %v1038_v13 = vld [vmem:[#allocation5 + $0x28] sm:$0xff] }
 0x1bb   : > { %v417_v47 = vsub.f32 1.5, %v416_v45  ;;  %637 = vmatpush.bf16.msra.mxu2 %v1038_v13 }
 0x1bc   : > { %v429_v54 = vadd.f32 %v1139_v50, %v426_v49 }
 0x1bd   : > { %v418_v48 = vmul.f32 %v1150_v39, %v417_v47 }
 0x1be   : > { %v431_v56 = vmax.f32 %v429_v54, 0.0 }
 0x1bf   : > { %v422_v51 = vsel %vm421_vm6, %v1150_v39, %v418_v48  ;;  %638 = vmatpush.bf16.msra.mxu2 %v1037_v14 }
 0x1c0   : > { %v425_v52 = vmul.f32 %v1138_v42, %v422_v51 }
 0x1c2   : > { %v427_v53 = vmul.f32 %v425_v52, %v392_v18 }
 0x1c3   : > { %639 = vmatpush.bf16.msra.mxu2 %v1036_v15 }
 0x1c4   : > { %v430_v55 = vadd.f32 %v1139_v50, %v427_v53  ;;  %v1143_v50 = vld [vmem:[#allocation8 + $0x6] ss:$0 sm:$0xff] }
 0x1c6   : > { %v432_v57 = vmax.f32 %v430_v55, 0.0 }
 0x1c7   : > { %640 = vmatpush.bf16.msra.mxu2 %v1035_v16 }
 0x1c8   : > { %v436_v58 = vpack.c.bf16 %v432_v57, %v431_v56 }
 0x1ca   : > { %510 = vmatmul.bf16.vlgmr.msra.gmra.mxu1 %v436_v58 }
 0x1cb   : > { %641 = vmatpush.bf16.msra.mxu2 %v1034_v17 }
 0x1cf   : > { %642 = vmatpush.bf16.msra.mxu2 %v1033_v20 }
 0x247   : > { %v511_v60 = vpop.f32.mrf.mxu1 }
 0x248   : > { %v512_v61 = vadd.f32 %v1140_v59, %v511_v60 }
 0x24a   : > { %516 = vadd.xlane.f32.xlu2 %v512_v61 }
 0x24f   : > { %v513_v62 = vpop.f32.mrf.mxu1 }
 0x250   : > { %v514_v63 = vadd.f32 %v1140_v59, %v513_v62 }
 0x252   : > { %518 = vadd.xlane.f32.xlu2 %v514_v63 }
 0x2bd   : > { %v517_v0 = vpop.xlane.xlu2 %516 }
 0x2be   : > { %v520_v1 = vmul.f32 0.03125, %v517_v0 }
 0x2c0   : > { %v522_v2 = vsub.f32 %v512_v61, %v520_v1  ;;  %v1048_v1 = vld [vmem:[#allocation7 + $0x38] sm:$0xff] }
 0x2c1   : > { %768 = vmatpush.bf16.msra.mxu3 %v1048_v1 }
 0x2c2   : > { %v524_v3 = vmul.f32 %v1504_v11, %v522_v2  ;;  %v1047_v2 = vld [vmem:[#allocation7 + $0x30] sm:$0xff] }
 0x2c4   : > { %v526_v4 = vmul.f32 %v524_v3, %v524_v3 }
 0x2c5   : > { %v519_v5 = vpop.xlane.xlu2 %518  ;;  %769 = vmatpush.bf16.msra.mxu3 %v1047_v2 }
 0x2c6   : > { %v521_v6 = vmul.f32 0.03125, %v519_v5  ;;  %528 = vadd.xlane.f32.xlu0 %v526_v4  ;;  %v1045_v4 = vld [vmem:[#allocation7 + $0x20] sm:$0xff]  ;;  %v1044_v5 = vld [vmem:[#allocation7 + $0x18] sm:$0xff] }
 0x2c8   : > { %v523_v7 = vsub.f32 %v514_v63, %v521_v6  ;;  %v1043_v6 = vld [vmem:[#allocation7 + $0x10] sm:$0xff] }
 0x2ca   : > { %v525_v8 = vmul.f32 %v1504_v11, %v523_v7  ;;  %v1042_v7 = vld [vmem:[#allocation7 + $0x8] sm:$0xff] }
 0x2cc   : > { %v527_v9 = vmul.f32 %v525_v8, %v525_v8 }
 0x2ce   : > { %530 = vadd.xlane.f32.xlu1 %v527_v9 }
 0x339   : > { %v529_v18 = vpop.xlane.xlu0 %528 }
 0x33a   : > { %v532_v19 = vmul.f32 0.03125, %v529_v18 }
 0x33c   : > { %v534_v21 = vadd.f32 1e-05, %v532_v19 }
 0x33e   : > { %1151 = vrsqrt.f32 %v534_v21  ;;  %vm542_vm8 = vweird.f32 %v534_v21 }
 0x341   : > { %v531_v22 = vpop.xlane.xlu1 %530 }
 0x342   : > { %v533_v23 = vmul.f32 0.03125, %v531_v22 }
 0x344   : > { %v1152_v24 = vpop.eup %1151  ;;  %v535_v25 = vadd.f32 1e-05, %v533_v23  ;;  %v1144_v23 = vld [vmem:[#allocation8 + $0x7] ss:$0 sm:$0xff] }
 0x345   : > { %v537_v26 = vmul.f32 %v1152_v24, %v534_v21  ;;  %vm543_vm7 = vweird.f32 %v1152_v24 }
 0x346   : > { %1153 = vrsqrt.f32 %v535_v25  ;;  %vm544_vm9 = vmor %vm542_vm8, %vm543_vm7  ;;  %vm552_vm11 = vweird.f32 %v535_v25 }
 0x347   : > { %v538_v27 = vmul.f32 %v1152_v24, %v537_v26 }
 0x349   : > { %v539_v28 = vmul.f32 0.5, %v538_v27 }
 0x34b   : > { %v540_v29 = vsub.f32 1.5, %v539_v28 }
 0x34c   : > { %v1154_v30 = vpop.eup %1153 }
 0x34d   : > { %v541_v31 = vmul.f32 %v1152_v24, %v540_v29  ;;  %v547_v32 = vmul.f32 %v1154_v30, %v535_v25  ;;  %vm553_vm10 = vweird.f32 %v1154_v30 }
 0x34e   : > { %vm554_vm12 = vmor %vm552_vm11, %vm553_vm10 }
 0x34f   : > { %v545_v34 = vsel %vm544_vm9, %v1152_v24, %v541_v31  ;;  %v548_v35 = vmul.f32 %v1154_v30, %v547_v32  ;;  %v1145_v31 = vld [vmem:[#allocation8 + $0x8] ss:$0 sm:$0xff] }
 0x350   : > { %v557_v37 = vmul.f32 %v1141_v33, %v545_v34 }
 0x351   : > { %v549_v36 = vmul.f32 0.5, %v548_v35 }
 0x352   : > { %v559_v40 = vmul.f32 %v557_v37, %v524_v3  ;;  %v1046_v3 = vld [vmem:[#allocation7 + $0x28] sm:$0xff] }
 0x353   : > { %v550_v38 = vsub.f32 1.5, %v549_v36  ;;  %770 = vmatpush.bf16.msra.mxu3 %v1046_v3 }
 0x354   : > { %v562_v45 = vadd.f32 %v1142_v41, %v559_v40  ;;  %v1146_v40 = vld [vmem:[%s1577_s6] ss:$0 sm:$0xff] }
 0x355   : > { %v551_v39 = vmul.f32 %v1154_v30, %v550_v38 }
 0x356   : > { %v564_v47 = vmax.f32 %v562_v45, 0.0 }
 0x357   : > { %v555_v42 = vsel %vm554_vm12, %v1154_v30, %v551_v39  ;;  %771 = vmatpush.bf16.msra.mxu3 %v1045_v4 }
 0x358   : > { %v558_v43 = vmul.f32 %v1141_v33, %v555_v42 }
 0x35a   : > { %v560_v44 = vmul.f32 %v558_v43, %v525_v8 }
 0x35b   : > { %772 = vmatpush.bf16.msra.mxu3 %v1044_v5 }
 0x35c   : > { %v563_v46 = vadd.f32 %v1142_v41, %v560_v44 }
 0x35e   : > { %v565_v48 = vmax.f32 %v563_v46, 0.0 }
 0x35f   : > { %773 = vmatpush.bf16.msra.mxu3 %v1043_v6 }
 0x360   : > { %v569_v49 = vpack.c.bf16 %v565_v48, %v564_v47 }
 0x362   : > { %643 = vmatmul.bf16.vlgmr.msra.gmra.mxu2 %v569_v49 }
 0x363   : > { %774 = vmatpush.bf16.msra.mxu3 %v1042_v7 }
 0x367   : > { %775 = vmatpush.bf16.msra.mxu3 %v1041_v10 }
 0x3e5   : > { %v644_v51 = vpop.f32.mrf.mxu2 }
 0x3e6   : > { %v645_v52 = vadd.f32 %v1143_v50, %v644_v51 }
 0x3e8   : > { %649 = vadd.xlane.f32.xlu2 %v645_v52 }
 0x3ed   : > { %v646_v53 = vpop.f32.mrf.mxu2 }
 0x3ee   : > { %v647_v54 = vadd.f32 %v1143_v50, %v646_v53 }
 0x3f0   : > { %651 = vadd.xlane.f32.xlu0 %v647_v54 }
 0x45b   : > { %v650_v55 = vpop.xlane.xlu2 %649 }
 0x45c   : > { %v653_v56 = vmul.f32 0.03125, %v650_v55 }
 0x45e   : > { %v655_v57 = vsub.f32 %v645_v52, %v653_v56 }
 0x460   : > { %v657_v58 = vmul.f32 %v1504_v11, %v655_v57 }
 0x462   : > { %v659_v59 = vmul.f32 %v657_v58, %v657_v58 }
 0x463   : > { %v652_v60 = vpop.xlane.xlu0 %651 }
 0x464   : > { %v654_v61 = vmul.f32 0.03125, %v652_v60  ;;  %661 = vadd.xlane.f32.xlu1 %v659_v59 }
 0x466   : > { %v656_v62 = vsub.f32 %v647_v54, %v654_v61 }
 0x468   : > { %v658_v63 = vmul.f32 %v1504_v11, %v656_v62 }
 0x46a   : > { %v660_v0 = vmul.f32 %v658_v63, %v658_v63 }
 0x46c   : > { %663 = vadd.xlane.f32.xlu2 %v660_v0 }
 0x4d7   : > { %v662_v8 = vpop.xlane.xlu1 %661 }
 0x4d8   : > { %v665_v9 = vmul.f32 0.03125, %v662_v8 }
 0x4da   : > { %v667_v11 = vadd.f32 1e-05, %v665_v9 }
 0x4dc   : > { %1155 = vrsqrt.f32 %v667_v11  ;;  %vm675_vm14 = vweird.f32 %v667_v11 }
 0x4df   : > { %v664_v12 = vpop.xlane.xlu2 %663 }
 0x4e0   : > { %v666_v13 = vmul.f32 0.03125, %v664_v12 }
 0x4e2   : > { %v1156_v14 = vpop.eup %1155  ;;  %v668_v15 = vadd.f32 1e-05, %v666_v13 }
 0x4e3   : > { %v670_v16 = vmul.f32 %v1156_v14, %v667_v11  ;;  %vm676_vm13 = vweird.f32 %v1156_v14 }
 0x4e4   : > { %1157 = vrsqrt.f32 %v668_v15  ;;  %vm677_vm15 = vmor %vm675_vm14, %vm676_vm13  ;;  %vm685_vm1 = vweird.f32 %v668_v15 }
 0x4e5   : > { %v671_v17 = vmul.f32 %v1156_v14, %v670_v16 }
 0x4e7   : > { %v672_v18 = vmul.f32 0.5, %v671_v17 }
 0x4e9   : > { %v673_v19 = vsub.f32 1.5, %v672_v18 }
 0x4ea   : > { %v1158_v20 = vpop.eup %1157 }
 0x4eb   : > { %v674_v21 = vmul.f32 %v1156_v14, %v673_v19  ;;  %v680_v22 = vmul.f32 %v1158_v20, %v668_v15  ;;  %vm686_vm0 = vweird.f32 %v1158_v20 }
 0x4ec   : > { %vm687_vm2 = vmor %vm685_vm1, %vm686_vm0 }
 0x4ed   : > { %v678_v24 = vsel %vm677_vm15, %v1156_v14, %v674_v21  ;;  %v681_v25 = vmul.f32 %v1158_v20, %v680_v22 }
 0x4ee   : > { %v690_v27 = vmul.f32 %v1144_v23, %v678_v24 }
 0x4ef   : > { %v682_v26 = vmul.f32 0.5, %v681_v25 }
 0x4f0   : > { %v692_v30 = vmul.f32 %v690_v27, %v657_v58 }
 0x4f1   : > { %v683_v28 = vsub.f32 1.5, %v682_v26 }
 0x4f2   : > { %v695_v35 = vadd.f32 %v1145_v31, %v692_v30 }
 0x4f3   : > { %v684_v29 = vmul.f32 %v1158_v20, %v683_v28 }
 0x4f4   : > { %v697_v37 = vmax.f32 %v695_v35, 0.0 }
 0x4f5   : > { %v688_v32 = vsel %vm687_vm2, %v1158_v20, %v684_v29 }
 0x4f6   : > { %v691_v33 = vmul.f32 %v1144_v23, %v688_v32 }
 0x4f8   : > { %v693_v34 = vmul.f32 %v691_v33, %v658_v63 }
 0x4fa   : > { %v696_v36 = vadd.f32 %v1145_v31, %v693_v34 }
 0x4fc   : > { %v698_v38 = vmax.f32 %v696_v36, 0.0 }
 0x4fe   : > { %v699_v39 = vpack.c.bf16 %v698_v38, %v697_v37 }
 0x500   : > { %776 = vmatmul.bf16.vlgmr.msra.gmra.mxu3 %v699_v39 }
 0x583   : > { %v777_v41 = vpop.f32.mrf.mxu3 }
 0x584   : > { %v778_v42 = vadd.f32 %v1146_v40, %v777_v41 }
 0x586   : > { %782 = vst [vmem:[%s339_s21] sm:$0xff] %v778_v42 }
 0x58b   : > { %v779_v43 = vpop.f32.mrf.mxu3 }
 0x58c   : > { %v780_v44 = vadd.f32 %v1146_v40, %v779_v43 }
 0x58e   : > { %783 = vst [vmem:[%s339_s21 + $0x8] sm:$0xff] %v780_v44 }
 0x58f   : > { %1306 = shalt.err (!%p1303_p8)
}
 0x590   : > { %s1363_s19 = smov 128   ;;  %s1364_s23 = smov 8  }
 0x591   : > { %1066 = dma.vmem_to_hbm [thread:$0]  (%p1443_p5), %s798_s16, 256, %s800_s22, %s785_s8, %s1363_s19, %s1363_s19, %s1364_s23  }
 0x592 PF: > { %p1093_p9 = scmp.ge.s32.totalorder %s1353_s27, 2  ;;  %s814_s29 = sand.u32 1, %s1341_s24  }
 0x593   : > { %s815_s9 = scalar_lea.sflag [#allocation4], %s814_s29 }
 0x594   : > { %p1082_p10 = pnand %p1093_p9, %p1447_p6 }
 0x596   : > { %p1083_p11 = pneg %p1082_p10 }
 0x598   : > { %1336 = dma.done.wait (%p1083_p11), %s815_s9, 256  }
 0x599   : > { %1338 = vsyncadd (%p1083_p11), %s815_s9, 4294967040  ;;  %s1588_s15 = sld [smem:[#allocation15_spill]]  ;;  %p20_p12 = scmp.ge.s32.totalorder %s1430_s30, 5  }
 0x59a   : > { %s1589_s24 = smov %s1345_s25  ;;  %s1590_s25 = smov %s1349_s26 }
 0x59b   : > { %s1592_s27 = smov %s1430_s30  ;;  %22 = sbr.rel (!%p20_p12) target bundleno = 9 (0x9), region = 100 }
 0x59f   : > { %s1591_s26 = smov %s1588_s15 }
 0x5a0   :  { %821 = vsyncpa [#allocation3], 1 }
 0x5a1   :  { %823 = vsyncpa [#allocation3 + $0x1], 1 }
 0x5a2   :  { %824 = vsyncpa [#allocation6], 1 }
 0x5a3   :  { %825 = vsyncpa [#allocation9], 1 }
 0x5a4   :  { %826 = vsyncpa [#allocation4], 1 }
 0x5a5   :  { %828 = vsyncpa [#allocation4 + $0x1], 1 }

</bundles_post_ra>
